<compile_context>
chip_gen: v5e
topology: v5e:2x2
jax: 0.10.0
libtpu: 0.0.40
codegen_flags: <defaults>
</compile_context>

<pallas_src>
import functools

import jax
import jax.numpy as jnp
import numpy as np
from jax.experimental import pallas as pl
from jax.experimental.pallas import tpu as pltpu


def _spatial_attention_kernel(x_ref, mask_ref, w_ref, o_ref,
                              sum_ref, max_ref, pada_ref, padm_ref,
                              *, K, PAD, H, W, C):
    # x_ref:    (1, Ct, H*W) VMEM block (lane-dense channel chunk)
    # mask_ref: (K, H*W) VMEM, per-dx column-validity masks (0/1 float32)
    # w_ref:    (2*K*K,) SMEM (flattened OIHW weight, O=1)
    # o_ref:    (1, 1, H*W) VMEM block
    # sum_ref/max_ref: (1, H*W) running channel sum / max
    # pada_ref/padm_ref: (1, H*W + 2*PADF) zero-padded flat mean / max planes
    HW = H * W
    PADF = PAD * W + PAD
    k = pl.program_id(1)
    nk = pl.num_programs(1)

    # ---- streaming channel reduction on a lane-dense (Ct, H*W) chunk ----
    x = x_ref[0].astype(jnp.float32)                   # (Ct, HW)
    csum = jnp.sum(x, axis=0, keepdims=True)           # (1, HW)
    cmax = jnp.max(x, axis=0, keepdims=True)           # (1, HW)

    @pl.when(k == 0)
    def _():
        sum_ref[...] = csum
        max_ref[...] = cmax

    @pl.when(k > 0)
    def _():
        sum_ref[...] = sum_ref[...] + csum
        max_ref[...] = jnp.maximum(max_ref[...], cmax)

    # ---- on the last channel chunk: KxK conv + sigmoid, all in flat space ----
    @pl.when(k == nk - 1)
    def _():
        # zero-padded flat planes (channel 0 = mean, channel 1 = max)
        pada_ref[...] = jnp.zeros_like(pada_ref)
        padm_ref[...] = jnp.zeros_like(padm_ref)
        pada_ref[:, PADF:PADF + HW] = sum_ref[...] * (1.0 / C)
        padm_ref[:, PADF:PADF + HW] = max_ref[...]

        # load each padded plane once; taps are register lane-shifts
        planes = (pada_ref[...], padm_ref[...])        # 2 x (1, HW + 2*PADF)

        # hoist all conv weights out of the tap loops (scalar SMEM reads)
        wv = [w_ref[i] for i in range(2 * K * K)]

        acc = jnp.zeros((1, HW), jnp.float32)
        for dx in range(K):
            validf = mask_ref[dx:dx + 1, :]            # (1, HW) 0/1 column mask
            acc_dx = jnp.zeros((1, HW), jnp.float32)
            for c in range(2):
                for dy in range(K):
                    off = PADF + (dy - PAD) * W + (dx - PAD)
                    acc_dx = acc_dx + wv[c * K * K + dy * K + dx] * planes[c][:, off:off + HW]
            acc = acc + validf * acc_dx

        o_ref[...] = jax.nn.sigmoid(acc).astype(o_ref.dtype)[None]


def _pick_c_chunk(C, HW):
    """Largest multiple-of-8 divisor of C giving roughly a <=1 MiB input block."""
    cap = max(8, (1 << 20) // max(HW * 4, 1))
    best = None
    for ct in range(8, C + 1, 8):
        if C % ct == 0 and ct <= cap:
            best = ct
    return best if best is not None else C


def spatial_attention(x, w, kernel_size=7):
    """x: (N, C, H, W).  w: (1, 2, K, K) conv weight (OIHW, no bias)."""
    assert kernel_size in (3, 7), "kernel size must be 3 or 7"
    pad = 3 if kernel_size == 7 else 1
    K = kernel_size
    N, C, H, W = x.shape
    HW = H * W
    padf = pad * W + pad

    x_flat = x.reshape(N, C, HW)                       # lane-dense, free reshape
    w_flat = w.reshape(-1).astype(jnp.float32)         # (2*K*K,) scalars -> SMEM

    # per-dx column-validity masks (horizontal zero padding in flat space),
    # built once at trace time as a constant.
    cols = np.arange(HW, dtype=np.int64) % W
    masks = np.stack(
        [((cols + dx - pad >= 0) & (cols + dx - pad < W)).astype(np.float32)
         for dx in range(K)], axis=0)                  # (K, HW)
    masks = jnp.asarray(masks)

    ct = _pick_c_chunk(C, HW)
    grid = (N, C // ct)

    kernel = functools.partial(_spatial_attention_kernel,
                               K=K, PAD=pad, H=H, W=W, C=C)

    out_flat = pl.pallas_call(
        kernel,
        out_shape=jax.ShapeDtypeStruct((N, 1, HW), x.dtype),
        grid_spec=pltpu.PrefetchScalarGridSpec(
            num_scalar_prefetch=0,
            grid=grid,
            in_specs=[
                pl.BlockSpec((1, ct, HW), lambda n, k: (n, k, 0)),
                pl.BlockSpec((K, HW), lambda n, k: (0, 0)),
                pl.BlockSpec(memory_space=pltpu.MemorySpace.SMEM),
            ],
            out_specs=pl.BlockSpec((1, 1, HW), lambda n, k: (n, 0, 0)),
            scratch_shapes=[
                pltpu.VMEM((1, HW), jnp.float32),              # running channel sum
                pltpu.VMEM((1, HW), jnp.float32),              # running channel max
                pltpu.VMEM((1, HW + 2 * padf), jnp.float32),   # padded flat mean plane
                pltpu.VMEM((1, HW + 2 * padf), jnp.float32),   # padded flat max plane
            ],
        ),
        compiler_params=pltpu.CompilerParams(
            dimension_semantics=("parallel", "arbitrary"),
        ),
    )(x_flat, masks, w_flat)

    return out_flat.reshape(N, 1, H, W)


def _reference(x, w, kernel_size=7):
    pad = 3 if kernel_size == 7 else 1
    avg = jnp.mean(x, axis=1, keepdims=True)
    mx = jnp.max(x, axis=1, keepdims=True)
    xc = jnp.concatenate([avg, mx], axis=1)
    out = jax.lax.conv_general_dilated(
        xc, w, window_strides=(1, 1),
        padding=[(pad, pad), (pad, pad)],
        dimension_numbers=("NCHW", "OIHW", "NCHW"))
    return jax.nn.sigmoid(out)


if __name__ == "__main__":
    key = jax.random.PRNGKey(0)
    kx, kw = jax.random.split(key)

    N, C, H, W = 2, 4, 16, 16
    K = 7

    x = jax.random.normal(kx, (N, C, H, W), jnp.float32)
    # deterministic conv weight init (kaiming-uniform-like bound, no bias)
    fan_in = 2 * K * K
    bound = (1.0 / fan_in) ** 0.5
    w = jax.random.uniform(kw, (1, 2, K, K), jnp.float32, -bound, bound)

    out = jax.block_until_ready(spatial_attention(x, w, kernel_size=K))
    ref = _reference(x, w, kernel_size=K)

    assert out.shape == (N, 1, H, W)
    assert jnp.allclose(out, ref, atol=1e-5, rtol=1e-5)

    print("KERNEL_OK")
</pallas_src>

<mosaic_0001>
module attributes {stable_mosaic.version = 11 : i64} {
  func.func @_spatial_attention_kernel(%arg0: i32, %arg1: i32, %arg2: memref<1x4x256xf32, #tpu.memory_space<vmem>>, %arg3: memref<7x256xf32, #tpu.memory_space<vmem>>, %arg4: memref<98xf32, #tpu.memory_space<smem>>, %arg5: memref<1x1x256xf32, #tpu.memory_space<vmem>>, %arg6: memref<1x256xf32, #tpu.memory_space<vmem>>, %arg7: memref<1x256xf32, #tpu.memory_space<vmem>>, %arg8: memref<1x358xf32, #tpu.memory_space<vmem>>, %arg9: memref<1x358xf32, #tpu.memory_space<vmem>>) attributes {dimension_semantics = [#tpu.dimension_semantics<parallel>, #tpu.dimension_semantics<arbitrary>], iteration_bounds = array<i64: 2, 1>, scalar_prefetch = 0 : i64, scratch_operands = 4 : i64, tpu.core_type = #tpu.core_type<tc>, window_params = [{transform_indices = @transform_0, window_bounds = array<i64: 1, 4, 256>}, {pipeline_mode = #tpu.pipeline_mode<synchronous>, transform_indices = @transform_1, window_bounds = array<i64: 7, 256>}, {transform_indices = @transform_2, window_bounds = array<i64: 98>}, {transform_indices = @transform_3, window_bounds = array<i64: 1, 1, 256>}]} {
    %c0 = arith.constant 0 : index
    %c0_0 = arith.constant 0 : index
    %c0_1 = arith.constant 0 : index
    %0 = vector.load %arg2[%c0, %c0_0, %c0_1] : memref<1x4x256xf32, #tpu.memory_space<vmem>>, vector<1x4x256xf32>
    %1 = vector.shape_cast %0 : vector<1x4x256xf32> to vector<4x256xf32>
    %cst = arith.constant dense<0.000000e+00> : vector<256xf32>
    %2 = vector.multi_reduction <add>, %1, %cst [0] : vector<4x256xf32> to vector<256xf32>
    %3 = vector.shape_cast %2 : vector<256xf32> to vector<1x256xf32>
    %cst_2 = arith.constant dense<0xFF800000> : vector<256xf32>
    %4 = vector.multi_reduction <maximumf>, %1, %cst_2 [0] : vector<4x256xf32> to vector<256xf32>
    %5 = vector.shape_cast %4 : vector<256xf32> to vector<1x256xf32>
    %c0_i32 = arith.constant 0 : i32
    %6 = arith.cmpi eq, %arg1, %c0_i32 : i32
    %7 = arith.extui %6 : i1 to i32
    %c0_i32_3 = arith.constant 0 : i32
    %8 = arith.cmpi ne, %7, %c0_i32_3 : i32
    scf.if %8 {
      %c0_8 = arith.constant 0 : index
      %c0_9 = arith.constant 0 : index
      %15 = vector.load %arg6[%c0_8, %c0_9] : memref<1x256xf32, #tpu.memory_space<vmem>>, vector<1x256xf32>
      tpu.vector_store %arg6[%c0_8, %c0_9], %3 {strides = array<i32>} : memref<1x256xf32, #tpu.memory_space<vmem>>, vector<1x256xf32>,
      %c0_10 = arith.constant 0 : index
      %c0_11 = arith.constant 0 : index
      %16 = vector.load %arg7[%c0_10, %c0_11] : memref<1x256xf32, #tpu.memory_space<vmem>>, vector<1x256xf32>
      tpu.vector_store %arg7[%c0_10, %c0_11], %5 {strides = array<i32>} : memref<1x256xf32, #tpu.memory_space<vmem>>, vector<1x256xf32>,
    } else {
    }
    %c0_i32_4 = arith.constant 0 : i32
    %9 = arith.cmpi sgt, %arg1, %c0_i32_4 : i32
    %10 = arith.extui %9 : i1 to i32
    %c0_i32_5 = arith.constant 0 : i32
    %11 = arith.cmpi ne, %10, %c0_i32_5 : i32
    scf.if %11 {
      %c0_8 = arith.constant 0 : index
      %c0_9 = arith.constant 0 : index
      %15 = vector.load %arg6[%c0_8, %c0_9] : memref<1x256xf32, #tpu.memory_space<vmem>>, vector<1x256xf32>
      %16 = arith.addf %15, %3 : vector<1x256xf32>
      %c0_10 = arith.constant 0 : index
      %c0_11 = arith.constant 0 : index
      %17 = vector.load %arg6[%c0_10, %c0_11] : memref<1x256xf32, #tpu.memory_space<vmem>>, vector<1x256xf32>
      tpu.vector_store %arg6[%c0_10, %c0_11], %16 {strides = array<i32>} : memref<1x256xf32, #tpu.memory_space<vmem>>, vector<1x256xf32>,
      %c0_12 = arith.constant 0 : index
      %c0_13 = arith.constant 0 : index
      %18 = vector.load %arg7[%c0_12, %c0_13] : memref<1x256xf32, #tpu.memory_space<vmem>>, vector<1x256xf32>
      %19 = arith.maximumf %18, %5 : vector<1x256xf32>
      %c0_14 = arith.constant 0 : index
      %c0_15 = arith.constant 0 : index
      %20 = vector.load %arg7[%c0_14, %c0_15] : memref<1x256xf32, #tpu.memory_space<vmem>>, vector<1x256xf32>
      tpu.vector_store %arg7[%c0_14, %c0_15], %19 {strides = array<i32>} : memref<1x256xf32, #tpu.memory_space<vmem>>, vector<1x256xf32>,
    } else {
    }
    %c0_i32_6 = arith.constant 0 : i32
    %12 = arith.cmpi eq, %arg1, %c0_i32_6 : i32
    %13 = arith.extui %12 : i1 to i32
    %c0_i32_7 = arith.constant 0 : i32
    %14 = arith.cmpi ne, %13, %c0_i32_7 : i32
    scf.if %14 {
      %cst_8 = arith.constant 0.000000e+00 : f32
      %15 = vector.broadcast %cst_8 : f32 to vector<1x358xf32>
      %c0_9 = arith.constant 0 : index
      %c0_10 = arith.constant 0 : index
      %16 = vector.load %arg8[%c0_9, %c0_10] : memref<1x358xf32, #tpu.memory_space<vmem>>, vector<1x358xf32>
      tpu.vector_store %arg8[%c0_9, %c0_10], %15 {strides = array<i32>} : memref<1x358xf32, #tpu.memory_space<vmem>>, vector<1x358xf32>,
      %cst_11 = arith.constant 0.000000e+00 : f32
      %17 = vector.broadcast %cst_11 : f32 to vector<1x358xf32>
      %c0_12 = arith.constant 0 : index
      %c0_13 = arith.constant 0 : index
      %18 = vector.load %arg9[%c0_12, %c0_13] : memref<1x358xf32, #tpu.memory_space<vmem>>, vector<1x358xf32>
      tpu.vector_store %arg9[%c0_12, %c0_13], %17 {strides = array<i32>} : memref<1x358xf32, #tpu.memory_space<vmem>>, vector<1x358xf32>,
      %c0_14 = arith.constant 0 : index
      %c0_15 = arith.constant 0 : index
      %19 = vector.load %arg6[%c0_14, %c0_15] : memref<1x256xf32, #tpu.memory_space<vmem>>, vector<1x256xf32>
      %cst_16 = arith.constant 2.500000e-01 : f32
      %20 = vector.broadcast %cst_16 : f32 to vector<1x256xf32>
      %21 = arith.mulf %19, %20 : vector<1x256xf32>
      %c0_17 = arith.constant 0 : index
      %c51 = arith.constant 51 : index
      %22 = vector.load %arg8[%c0_17, %c51] : memref<1x358xf32, #tpu.memory_space<vmem>>, vector<1x256xf32>
      tpu.vector_store %arg8[%c0_17, %c51], %21 {strides = array<i32>} : memref<1x358xf32, #tpu.memory_space<vmem>>, vector<1x256xf32>,
      %c0_18 = arith.constant 0 : index
      %c0_19 = arith.constant 0 : index
      %23 = vector.load %arg7[%c0_18, %c0_19] : memref<1x256xf32, #tpu.memory_space<vmem>>, vector<1x256xf32>
      %c0_20 = arith.constant 0 : index
      %c51_21 = arith.constant 51 : index
      %24 = vector.load %arg9[%c0_20, %c51_21] : memref<1x358xf32, #tpu.memory_space<vmem>>, vector<1x256xf32>
      tpu.vector_store %arg9[%c0_20, %c51_21], %23 {strides = array<i32>} : memref<1x358xf32, #tpu.memory_space<vmem>>, vector<1x256xf32>,
      %c0_22 = arith.constant 0 : index
      %c0_23 = arith.constant 0 : index
      %25 = vector.load %arg8[%c0_22, %c0_23] : memref<1x358xf32, #tpu.memory_space<vmem>>, vector<1x358xf32>
      %c0_24 = arith.constant 0 : index
      %c0_25 = arith.constant 0 : index
      %26 = vector.load %arg9[%c0_24, %c0_25] : memref<1x358xf32, #tpu.memory_space<vmem>>, vector<1x358xf32>
      %c0_26 = arith.constant 0 : index
      %27 = memref.load %arg4[%c0_26] : memref<98xf32, #tpu.memory_space<smem>>
      %c1 = arith.constant 1 : index
      %28 = memref.load %arg4[%c1] : memref<98xf32, #tpu.memory_space<smem>>
      %c2 = arith.constant 2 : index
      %29 = memref.load %arg4[%c2] : memref<98xf32, #tpu.memory_space<smem>>
      %c3 = arith.constant 3 : index
      %30 = memref.load %arg4[%c3] : memref<98xf32, #tpu.memory_space<smem>>
      %c4 = arith.constant 4 : index
      %31 = memref.load %arg4[%c4] : memref<98xf32, #tpu.memory_space<smem>>
      %c5 = arith.constant 5 : index
      %32 = memref.load %arg4[%c5] : memref<98xf32, #tpu.memory_space<smem>>
      %c6 = arith.constant 6 : index
      %33 = memref.load %arg4[%c6] : memref<98xf32, #tpu.memory_space<smem>>
      %c7 = arith.constant 7 : index
      %34 = memref.load %arg4[%c7] : memref<98xf32, #tpu.memory_space<smem>>
      %c8 = arith.constant 8 : index
      %35 = memref.load %arg4[%c8] : memref<98xf32, #tpu.memory_space<smem>>
      %c9 = arith.constant 9 : index
      %36 = memref.load %arg4[%c9] : memref<98xf32, #tpu.memory_space<smem>>
      %c10 = arith.constant 10 : index
      %37 = memref.load %arg4[%c10] : memref<98xf32, #tpu.memory_space<smem>>
      %c11 = arith.constant 11 : index
      %38 = memref.load %arg4[%c11] : memref<98xf32, #tpu.memory_space<smem>>
      %c12 = arith.constant 12 : index
      %39 = memref.load %arg4[%c12] : memref<98xf32, #tpu.memory_space<smem>>
      %c13 = arith.constant 13 : index
      %40 = memref.load %arg4[%c13] : memref<98xf32, #tpu.memory_space<smem>>
      %c14 = arith.constant 14 : index
      %41 = memref.load %arg4[%c14] : memref<98xf32, #tpu.memory_space<smem>>
      %c15 = arith.constant 15 : index
      %42 = memref.load %arg4[%c15] : memref<98xf32, #tpu.memory_space<smem>>
      %c16 = arith.constant 16 : index
      %43 = memref.load %arg4[%c16] : memref<98xf32, #tpu.memory_space<smem>>
      %c17 = arith.constant 17 : index
      %44 = memref.load %arg4[%c17] : memref<98xf32, #tpu.memory_space<smem>>
      %c18 = arith.constant 18 : index
      %45 = memref.load %arg4[%c18] : memref<98xf32, #tpu.memory_space<smem>>
      %c19 = arith.constant 19 : index
      %46 = memref.load %arg4[%c19] : memref<98xf32, #tpu.memory_space<smem>>
      %c20 = arith.constant 20 : index
      %47 = memref.load %arg4[%c20] : memref<98xf32, #tpu.memory_space<smem>>
      %c21 = arith.constant 21 : index
      %48 = memref.load %arg4[%c21] : memref<98xf32, #tpu.memory_space<smem>>
      %c22 = arith.constant 22 : index
      %49 = memref.load %arg4[%c22] : memref<98xf32, #tpu.memory_space<smem>>
      %c23 = arith.constant 23 : index
      %50 = memref.load %arg4[%c23] : memref<98xf32, #tpu.memory_space<smem>>
      %c24 = arith.constant 24 : index
      %51 = memref.load %arg4[%c24] : memref<98xf32, #tpu.memory_space<smem>>
      %c25 = arith.constant 25 : index
      %52 = memref.load %arg4[%c25] : memref<98xf32, #tpu.memory_space<smem>>
      %c26 = arith.constant 26 : index
      %53 = memref.load %arg4[%c26] : memref<98xf32, #tpu.memory_space<smem>>
      %c27 = arith.constant 27 : index
      %54 = memref.load %arg4[%c27] : memref<98xf32, #tpu.memory_space<smem>>
      %c28 = arith.constant 28 : index
      %55 = memref.load %arg4[%c28] : memref<98xf32, #tpu.memory_space<smem>>
      %c29 = arith.constant 29 : index
      %56 = memref.load %arg4[%c29] : memref<98xf32, #tpu.memory_space<smem>>
      %c30 = arith.constant 30 : index
      %57 = memref.load %arg4[%c30] : memref<98xf32, #tpu.memory_space<smem>>
      %c31 = arith.constant 31 : index
      %58 = memref.load %arg4[%c31] : memref<98xf32, #tpu.memory_space<smem>>
      %c32 = arith.constant 32 : index
      %59 = memref.load %arg4[%c32] : memref<98xf32, #tpu.memory_space<smem>>
      %c33 = arith.constant 33 : index
      %60 = memref.load %arg4[%c33] : memref<98xf32, #tpu.memory_space<smem>>
      %c34 = arith.constant 34 : index
      %61 = memref.load %arg4[%c34] : memref<98xf32, #tpu.memory_space<smem>>
      %c35 = arith.constant 35 : index
      %62 = memref.load %arg4[%c35] : memref<98xf32, #tpu.memory_space<smem>>
      %c36 = arith.constant 36 : index
      %63 = memref.load %arg4[%c36] : memref<98xf32, #tpu.memory_space<smem>>
      %c37 = arith.constant 37 : index
      %64 = memref.load %arg4[%c37] : memref<98xf32, #tpu.memory_space<smem>>
      %c38 = arith.constant 38 : index
      %65 = memref.load %arg4[%c38] : memref<98xf32, #tpu.memory_space<smem>>
      %c39 = arith.constant 39 : index
      %66 = memref.load %arg4[%c39] : memref<98xf32, #tpu.memory_space<smem>>
      %c40 = arith.constant 40 : index
      %67 = memref.load %arg4[%c40] : memref<98xf32, #tpu.memory_space<smem>>
      %c41 = arith.constant 41 : index
      %68 = memref.load %arg4[%c41] : memref<98xf32, #tpu.memory_space<smem>>
      %c42 = arith.constant 42 : index
      %69 = memref.load %arg4[%c42] : memref<98xf32, #tpu.memory_space<smem>>
      %c43 = arith.constant 43 : index
      %70 = memref.load %arg4[%c43] : memref<98xf32, #tpu.memory_space<smem>>
      %c44 = arith.constant 44 : index
      %71 = memref.load %arg4[%c44] : memref<98xf32, #tpu.memory_space<smem>>
      %c45 = arith.constant 45 : index
      %72 = memref.load %arg4[%c45] : memref<98xf32, #tpu.memory_space<smem>>
      %c46 = arith.constant 46 : index
      %73 = memref.load %arg4[%c46] : memref<98xf32, #tpu.memory_space<smem>>
      %c47 = arith.constant 47 : index
      %74 = memref.load %arg4[%c47] : memref<98xf32, #tpu.memory_space<smem>>
      %c48 = arith.constant 48 : index
      %75 = memref.load %arg4[%c48] : memref<98xf32, #tpu.memory_space<smem>>
      %c49 = arith.constant 49 : index
      %76 = memref.load %arg4[%c49] : memref<98xf32, #tpu.memory_space<smem>>
      %c50 = arith.constant 50 : index
      %77 = memref.load %arg4[%c50] : memref<98xf32, #tpu.memory_space<smem>>
      %c51_27 = arith.constant 51 : index
      %78 = memref.load %arg4[%c51_27] : memref<98xf32, #tpu.memory_space<smem>>
      %c52 = arith.constant 52 : index
      %79 = memref.load %arg4[%c52] : memref<98xf32, #tpu.memory_space<smem>>
      %c53 = arith.constant 53 : index
      %80 = memref.load %arg4[%c53] : memref<98xf32, #tpu.memory_space<smem>>
      %c54 = arith.constant 54 : index
      %81 = memref.load %arg4[%c54] : memref<98xf32, #tpu.memory_space<smem>>
      %c55 = arith.constant 55 : index
      %82 = memref.load %arg4[%c55] : memref<98xf32, #tpu.memory_space<smem>>
      %c56 = arith.constant 56 : index
      %83 = memref.load %arg4[%c56] : memref<98xf32, #tpu.memory_space<smem>>
      %c57 = arith.constant 57 : index
      %84 = memref.load %arg4[%c57] : memref<98xf32, #tpu.memory_space<smem>>
      %c58 = arith.constant 58 : index
      %85 = memref.load %arg4[%c58] : memref<98xf32, #tpu.memory_space<smem>>
      %c59 = arith.constant 59 : index
      %86 = memref.load %arg4[%c59] : memref<98xf32, #tpu.memory_space<smem>>
      %c60 = arith.constant 60 : index
      %87 = memref.load %arg4[%c60] : memref<98xf32, #tpu.memory_space<smem>>
      %c61 = arith.constant 61 : index
      %88 = memref.load %arg4[%c61] : memref<98xf32, #tpu.memory_space<smem>>
      %c62 = arith.constant 62 : index
      %89 = memref.load %arg4[%c62] : memref<98xf32, #tpu.memory_space<smem>>
      %c63 = arith.constant 63 : index
      %90 = memref.load %arg4[%c63] : memref<98xf32, #tpu.memory_space<smem>>
      %c64 = arith.constant 64 : index
      %91 = memref.load %arg4[%c64] : memref<98xf32, #tpu.memory_space<smem>>
      %c65 = arith.constant 65 : index
      %92 = memref.load %arg4[%c65] : memref<98xf32, #tpu.memory_space<smem>>
      %c66 = arith.constant 66 : index
      %93 = memref.load %arg4[%c66] : memref<98xf32, #tpu.memory_space<smem>>
      %c67 = arith.constant 67 : index
      %94 = memref.load %arg4[%c67] : memref<98xf32, #tpu.memory_space<smem>>
      %c68 = arith.constant 68 : index
      %95 = memref.load %arg4[%c68] : memref<98xf32, #tpu.memory_space<smem>>
      %c69 = arith.constant 69 : index
      %96 = memref.load %arg4[%c69] : memref<98xf32, #tpu.memory_space<smem>>
      %c70 = arith.constant 70 : index
      %97 = memref.load %arg4[%c70] : memref<98xf32, #tpu.memory_space<smem>>
      %c71 = arith.constant 71 : index
      %98 = memref.load %arg4[%c71] : memref<98xf32, #tpu.memory_space<smem>>
      %c72 = arith.constant 72 : index
      %99 = memref.load %arg4[%c72] : memref<98xf32, #tpu.memory_space<smem>>
      %c73 = arith.constant 73 : index
      %100 = memref.load %arg4[%c73] : memref<98xf32, #tpu.memory_space<smem>>
      %c74 = arith.constant 74 : index
      %101 = memref.load %arg4[%c74] : memref<98xf32, #tpu.memory_space<smem>>
      %c75 = arith.constant 75 : index
      %102 = memref.load %arg4[%c75] : memref<98xf32, #tpu.memory_space<smem>>
      %c76 = arith.constant 76 : index
      %103 = memref.load %arg4[%c76] : memref<98xf32, #tpu.memory_space<smem>>
      %c77 = arith.constant 77 : index
      %104 = memref.load %arg4[%c77] : memref<98xf32, #tpu.memory_space<smem>>
      %c78 = arith.constant 78 : index
      %105 = memref.load %arg4[%c78] : memref<98xf32, #tpu.memory_space<smem>>
      %c79 = arith.constant 79 : index
      %106 = memref.load %arg4[%c79] : memref<98xf32, #tpu.memory_space<smem>>
      %c80 = arith.constant 80 : index
      %107 = memref.load %arg4[%c80] : memref<98xf32, #tpu.memory_space<smem>>
      %c81 = arith.constant 81 : index
      %108 = memref.load %arg4[%c81] : memref<98xf32, #tpu.memory_space<smem>>
      %c82 = arith.constant 82 : index
      %109 = memref.load %arg4[%c82] : memref<98xf32, #tpu.memory_space<smem>>
      %c83 = arith.constant 83 : index
      %110 = memref.load %arg4[%c83] : memref<98xf32, #tpu.memory_space<smem>>
      %c84 = arith.constant 84 : index
      %111 = memref.load %arg4[%c84] : memref<98xf32, #tpu.memory_space<smem>>
      %c85 = arith.constant 85 : index
      %112 = memref.load %arg4[%c85] : memref<98xf32, #tpu.memory_space<smem>>
      %c86 = arith.constant 86 : index
      %113 = memref.load %arg4[%c86] : memref<98xf32, #tpu.memory_space<smem>>
      %c87 = arith.constant 87 : index
      %114 = memref.load %arg4[%c87] : memref<98xf32, #tpu.memory_space<smem>>
      %c88 = arith.constant 88 : index
      %115 = memref.load %arg4[%c88] : memref<98xf32, #tpu.memory_space<smem>>
      %c89 = arith.constant 89 : index
      %116 = memref.load %arg4[%c89] : memref<98xf32, #tpu.memory_space<smem>>
      %c90 = arith.constant 90 : index
      %117 = memref.load %arg4[%c90] : memref<98xf32, #tpu.memory_space<smem>>
      %c91 = arith.constant 91 : index
      %118 = memref.load %arg4[%c91] : memref<98xf32, #tpu.memory_space<smem>>
      %c92 = arith.constant 92 : index
      %119 = memref.load %arg4[%c92] : memref<98xf32, #tpu.memory_space<smem>>
      %c93 = arith.constant 93 : index
      %120 = memref.load %arg4[%c93] : memref<98xf32, #tpu.memory_space<smem>>
      %c94 = arith.constant 94 : index
      %121 = memref.load %arg4[%c94] : memref<98xf32, #tpu.memory_space<smem>>
      %c95 = arith.constant 95 : index
      %122 = memref.load %arg4[%c95] : memref<98xf32, #tpu.memory_space<smem>>
      %c96 = arith.constant 96 : index
      %123 = memref.load %arg4[%c96] : memref<98xf32, #tpu.memory_space<smem>>
      %c97 = arith.constant 97 : index
      %124 = memref.load %arg4[%c97] : memref<98xf32, #tpu.memory_space<smem>>
      %cst_28 = arith.constant 0.000000e+00 : f32
      %125 = vector.broadcast %cst_28 : f32 to vector<1x256xf32>
      %c0_29 = arith.constant 0 : index
      %c0_30 = arith.constant 0 : index
      %126 = vector.load %arg3[%c0_29, %c0_30] : memref<7x256xf32, #tpu.memory_space<vmem>>, vector<1x256xf32>
      %cst_31 = arith.constant 0.000000e+00 : f32
      %127 = vector.broadcast %cst_31 : f32 to vector<1x256xf32>
      %128 = vector.extract_strided_slice %25 {offsets = [0, 0], sizes = [1, 256], strides = [1, 1]} : vector<1x358xf32> to vector<1x256xf32>
      %129 = vector.broadcast %27 : f32 to vector<1x256xf32>
      %130 = arith.mulf %129, %128 : vector<1x256xf32>
      %131 = arith.addf %127, %130 : vector<1x256xf32>
      %132 = vector.extract_strided_slice %25 {offsets = [0, 16], sizes = [1, 256], strides = [1, 1]} : vector<1x358xf32> to vector<1x256xf32>
      %133 = vector.broadcast %34 : f32 to vector<1x256xf32>
      %134 = arith.mulf %133, %132 : vector<1x256xf32>
      %135 = arith.addf %131, %134 : vector<1x256xf32>
      %136 = vector.extract_strided_slice %25 {offsets = [0, 32], sizes = [1, 256], strides = [1, 1]} : vector<1x358xf32> to vector<1x256xf32>
      %137 = vector.broadcast %41 : f32 to vector<1x256xf32>
      %138 = arith.mulf %137, %136 : vector<1x256xf32>
      %139 = arith.addf %135, %138 : vector<1x256xf32>
      %140 = vector.extract_strided_slice %25 {offsets = [0, 48], sizes = [1, 256], strides = [1, 1]} : vector<1x358xf32> to vector<1x256xf32>
      %141 = vector.broadcast %48 : f32 to vector<1x256xf32>
      %142 = arith.mulf %141, %140 : vector<1x256xf32>
      %143 = arith.addf %139, %142 : vector<1x256xf32>
      %144 = vector.extract_strided_slice %25 {offsets = [0, 64], sizes = [1, 256], strides = [1, 1]} : vector<1x358xf32> to vector<1x256xf32>
      %145 = vector.broadcast %55 : f32 to vector<1x256xf32>
      %146 = arith.mulf %145, %144 : vector<1x256xf32>
      %147 = arith.addf %143, %146 : vector<1x256xf32>
      %148 = vector.extract_strided_slice %25 {offsets = [0, 80], sizes = [1, 256], strides = [1, 1]} : vector<1x358xf32> to vector<1x256xf32>
      %149 = vector.broadcast %62 : f32 to vector<1x256xf32>
      %150 = arith.mulf %149, %148 : vector<1x256xf32>
      %151 = arith.addf %147, %150 : vector<1x256xf32>
      %152 = vector.extract_strided_slice %25 {offsets = [0, 96], sizes = [1, 256], strides = [1, 1]} : vector<1x358xf32> to vector<1x256xf32>
      %153 = vector.broadcast %69 : f32 to vector<1x256xf32>
      %154 = arith.mulf %153, %152 : vector<1x256xf32>
      %155 = arith.addf %151, %154 : vector<1x256xf32>
      %156 = vector.extract_strided_slice %26 {offsets = [0, 0], sizes = [1, 256], strides = [1, 1]} : vector<1x358xf32> to vector<1x256xf32>
      %157 = vector.broadcast %76 : f32 to vector<1x256xf32>
      %158 = arith.mulf %157, %156 : vector<1x256xf32>
      %159 = arith.addf %155, %158 : vector<1x256xf32>
      %160 = vector.extract_strided_slice %26 {offsets = [0, 16], sizes = [1, 256], strides = [1, 1]} : vector<1x358xf32> to vector<1x256xf32>
      %161 = vector.broadcast %83 : f32 to vector<1x256xf32>
      %162 = arith.mulf %161, %160 : vector<1x256xf32>
      %163 = arith.addf %159, %162 : vector<1x256xf32>
      %164 = vector.extract_strided_slice %26 {offsets = [0, 32], sizes = [1, 256], strides = [1, 1]} : vector<1x358xf32> to vector<1x256xf32>
      %165 = vector.broadcast %90 : f32 to vector<1x256xf32>
      %166 = arith.mulf %165, %164 : vector<1x256xf32>
      %167 = arith.addf %163, %166 : vector<1x256xf32>
      %168 = vector.extract_strided_slice %26 {offsets = [0, 48], sizes = [1, 256], strides = [1, 1]} : vector<1x358xf32> to vector<1x256xf32>
      %169 = vector.broadcast %97 : f32 to vector<1x256xf32>
      %170 = arith.mulf %169, %168 : vector<1x256xf32>
      %171 = arith.addf %167, %170 : vector<1x256xf32>
      %172 = vector.extract_strided_slice %26 {offsets = [0, 64], sizes = [1, 256], strides = [1, 1]} : vector<1x358xf32> to vector<1x256xf32>
      %173 = vector.broadcast %104 : f32 to vector<1x256xf32>
      %174 = arith.mulf %173, %172 : vector<1x256xf32>
      %175 = arith.addf %171, %174 : vector<1x256xf32>
      %176 = vector.extract_strided_slice %26 {offsets = [0, 80], sizes = [1, 256], strides = [1, 1]} : vector<1x358xf32> to vector<1x256xf32>
      %177 = vector.broadcast %111 : f32 to vector<1x256xf32>
      %178 = arith.mulf %177, %176 : vector<1x256xf32>
      %179 = arith.addf %175, %178 : vector<1x256xf32>
      %180 = vector.extract_strided_slice %26 {offsets = [0, 96], sizes = [1, 256], strides = [1, 1]} : vector<1x358xf32> to vector<1x256xf32>
      %181 = vector.broadcast %118 : f32 to vector<1x256xf32>
      %182 = arith.mulf %181, %180 : vector<1x256xf32>
      %183 = arith.addf %179, %182 : vector<1x256xf32>
      %184 = arith.mulf %126, %183 : vector<1x256xf32>
      %185 = arith.addf %125, %184 : vector<1x256xf32>
      %c1_32 = arith.constant 1 : index
      %c0_33 = arith.constant 0 : index
      %186 = vector.load %arg3[%c1_32, %c0_33] : memref<7x256xf32, #tpu.memory_space<vmem>>, vector<1x256xf32>
      %cst_34 = arith.constant 0.000000e+00 : f32
      %187 = vector.broadcast %cst_34 : f32 to vector<1x256xf32>
      %188 = vector.extract_strided_slice %25 {offsets = [0, 1], sizes = [1, 256], strides = [1, 1]} : vector<1x358xf32> to vector<1x256xf32>
      %189 = vector.broadcast %28 : f32 to vector<1x256xf32>
      %190 = arith.mulf %189, %188 : vector<1x256xf32>
      %191 = arith.addf %187, %190 : vector<1x256xf32>
      %192 = vector.extract_strided_slice %25 {offsets = [0, 17], sizes = [1, 256], strides = [1, 1]} : vector<1x358xf32> to vector<1x256xf32>
      %193 = vector.broadcast %35 : f32 to vector<1x256xf32>
      %194 = arith.mulf %193, %192 : vector<1x256xf32>
      %195 = arith.addf %191, %194 : vector<1x256xf32>
      %196 = vector.extract_strided_slice %25 {offsets = [0, 33], sizes = [1, 256], strides = [1, 1]} : vector<1x358xf32> to vector<1x256xf32>
      %197 = vector.broadcast %42 : f32 to vector<1x256xf32>
      %198 = arith.mulf %197, %196 : vector<1x256xf32>
      %199 = arith.addf %195, %198 : vector<1x256xf32>
      %200 = vector.extract_strided_slice %25 {offsets = [0, 49], sizes = [1, 256], strides = [1, 1]} : vector<1x358xf32> to vector<1x256xf32>
      %201 = vector.broadcast %49 : f32 to vector<1x256xf32>
      %202 = arith.mulf %201, %200 : vector<1x256xf32>
      %203 = arith.addf %199, %202 : vector<1x256xf32>
      %204 = vector.extract_strided_slice %25 {offsets = [0, 65], sizes = [1, 256], strides = [1, 1]} : vector<1x358xf32> to vector<1x256xf32>
      %205 = vector.broadcast %56 : f32 to vector<1x256xf32>
      %206 = arith.mulf %205, %204 : vector<1x256xf32>
      %207 = arith.addf %203, %206 : vector<1x256xf32>
      %208 = vector.extract_strided_slice %25 {offsets = [0, 81], sizes = [1, 256], strides = [1, 1]} : vector<1x358xf32> to vector<1x256xf32>
      %209 = vector.broadcast %63 : f32 to vector<1x256xf32>
      %210 = arith.mulf %209, %208 : vector<1x256xf32>
      %211 = arith.addf %207, %210 : vector<1x256xf32>
      %212 = vector.extract_strided_slice %25 {offsets = [0, 97], sizes = [1, 256], strides = [1, 1]} : vector<1x358xf32> to vector<1x256xf32>
      %213 = vector.broadcast %70 : f32 to vector<1x256xf32>
      %214 = arith.mulf %213, %212 : vector<1x256xf32>
      %215 = arith.addf %211, %214 : vector<1x256xf32>
      %216 = vector.extract_strided_slice %26 {offsets = [0, 1], sizes = [1, 256], strides = [1, 1]} : vector<1x358xf32> to vector<1x256xf32>
      %217 = vector.broadcast %77 : f32 to vector<1x256xf32>
      %218 = arith.mulf %217, %216 : vector<1x256xf32>
      %219 = arith.addf %215, %218 : vector<1x256xf32>
      %220 = vector.extract_strided_slice %26 {offsets = [0, 17], sizes = [1, 256], strides = [1, 1]} : vector<1x358xf32> to vector<1x256xf32>
      %221 = vector.broadcast %84 : f32 to vector<1x256xf32>
      %222 = arith.mulf %221, %220 : vector<1x256xf32>
      %223 = arith.addf %219, %222 : vector<1x256xf32>
      %224 = vector.extract_strided_slice %26 {offsets = [0, 33], sizes = [1, 256], strides = [1, 1]} : vector<1x358xf32> to vector<1x256xf32>
      %225 = vector.broadcast %91 : f32 to vector<1x256xf32>
      %226 = arith.mulf %225, %224 : vector<1x256xf32>
      %227 = arith.addf %223, %226 : vector<1x256xf32>
      %228 = vector.extract_strided_slice %26 {offsets = [0, 49], sizes = [1, 256], strides = [1, 1]} : vector<1x358xf32> to vector<1x256xf32>
      %229 = vector.broadcast %98 : f32 to vector<1x256xf32>
      %230 = arith.mulf %229, %228 : vector<1x256xf32>
      %231 = arith.addf %227, %230 : vector<1x256xf32>
      %232 = vector.extract_strided_slice %26 {offsets = [0, 65], sizes = [1, 256], strides = [1, 1]} : vector<1x358xf32> to vector<1x256xf32>
      %233 = vector.broadcast %105 : f32 to vector<1x256xf32>
      %234 = arith.mulf %233, %232 : vector<1x256xf32>
      %235 = arith.addf %231, %234 : vector<1x256xf32>
      %236 = vector.extract_strided_slice %26 {offsets = [0, 81], sizes = [1, 256], strides = [1, 1]} : vector<1x358xf32> to vector<1x256xf32>
      %237 = vector.broadcast %112 : f32 to vector<1x256xf32>
      %238 = arith.mulf %237, %236 : vector<1x256xf32>
      %239 = arith.addf %235, %238 : vector<1x256xf32>
      %240 = vector.extract_strided_slice %26 {offsets = [0, 97], sizes = [1, 256], strides = [1, 1]} : vector<1x358xf32> to vector<1x256xf32>
      %241 = vector.broadcast %119 : f32 to vector<1x256xf32>
      %242 = arith.mulf %241, %240 : vector<1x256xf32>
      %243 = arith.addf %239, %242 : vector<1x256xf32>
      %244 = arith.mulf %186, %243 : vector<1x256xf32>
      %245 = arith.addf %185, %244 : vector<1x256xf32>
      %c2_35 = arith.constant 2 : index
      %c0_36 = arith.constant 0 : index
      %246 = vector.load %arg3[%c2_35, %c0_36] : memref<7x256xf32, #tpu.memory_space<vmem>>, vector<1x256xf32>
      %cst_37 = arith.constant 0.000000e+00 : f32
      %247 = vector.broadcast %cst_37 : f32 to vector<1x256xf32>
      %248 = vector.extract_strided_slice %25 {offsets = [0, 2], sizes = [1, 256], strides = [1, 1]} : vector<1x358xf32> to vector<1x256xf32>
      %249 = vector.broadcast %29 : f32 to vector<1x256xf32>
      %250 = arith.mulf %249, %248 : vector<1x256xf32>
      %251 = arith.addf %247, %250 : vector<1x256xf32>
      %252 = vector.extract_strided_slice %25 {offsets = [0, 18], sizes = [1, 256], strides = [1, 1]} : vector<1x358xf32> to vector<1x256xf32>
      %253 = vector.broadcast %36 : f32 to vector<1x256xf32>
      %254 = arith.mulf %253, %252 : vector<1x256xf32>
      %255 = arith.addf %251, %254 : vector<1x256xf32>
      %256 = vector.extract_strided_slice %25 {offsets = [0, 34], sizes = [1, 256], strides = [1, 1]} : vector<1x358xf32> to vector<1x256xf32>
      %257 = vector.broadcast %43 : f32 to vector<1x256xf32>
      %258 = arith.mulf %257, %256 : vector<1x256xf32>
      %259 = arith.addf %255, %258 : vector<1x256xf32>
      %260 = vector.extract_strided_slice %25 {offsets = [0, 50], sizes = [1, 256], strides = [1, 1]} : vector<1x358xf32> to vector<1x256xf32>
      %261 = vector.broadcast %50 : f32 to vector<1x256xf32>
      %262 = arith.mulf %261, %260 : vector<1x256xf32>
      %263 = arith.addf %259, %262 : vector<1x256xf32>
      %264 = vector.extract_strided_slice %25 {offsets = [0, 66], sizes = [1, 256], strides = [1, 1]} : vector<1x358xf32> to vector<1x256xf32>
      %265 = vector.broadcast %57 : f32 to vector<1x256xf32>
      %266 = arith.mulf %265, %264 : vector<1x256xf32>
      %267 = arith.addf %263, %266 : vector<1x256xf32>
      %268 = vector.extract_strided_slice %25 {offsets = [0, 82], sizes = [1, 256], strides = [1, 1]} : vector<1x358xf32> to vector<1x256xf32>
      %269 = vector.broadcast %64 : f32 to vector<1x256xf32>
      %270 = arith.mulf %269, %268 : vector<1x256xf32>
      %271 = arith.addf %267, %270 : vector<1x256xf32>
      %272 = vector.extract_strided_slice %25 {offsets = [0, 98], sizes = [1, 256], strides = [1, 1]} : vector<1x358xf32> to vector<1x256xf32>
      %273 = vector.broadcast %71 : f32 to vector<1x256xf32>
      %274 = arith.mulf %273, %272 : vector<1x256xf32>
      %275 = arith.addf %271, %274 : vector<1x256xf32>
      %276 = vector.extract_strided_slice %26 {offsets = [0, 2], sizes = [1, 256], strides = [1, 1]} : vector<1x358xf32> to vector<1x256xf32>
      %277 = vector.broadcast %78 : f32 to vector<1x256xf32>
      %278 = arith.mulf %277, %276 : vector<1x256xf32>
      %279 = arith.addf %275, %278 : vector<1x256xf32>
      %280 = vector.extract_strided_slice %26 {offsets = [0, 18], sizes = [1, 256], strides = [1, 1]} : vector<1x358xf32> to vector<1x256xf32>
      %281 = vector.broadcast %85 : f32 to vector<1x256xf32>
      %282 = arith.mulf %281, %280 : vector<1x256xf32>
      %283 = arith.addf %279, %282 : vector<1x256xf32>
      %284 = vector.extract_strided_slice %26 {offsets = [0, 34], sizes = [1, 256], strides = [1, 1]} : vector<1x358xf32> to vector<1x256xf32>
      %285 = vector.broadcast %92 : f32 to vector<1x256xf32>
      %286 = arith.mulf %285, %284 : vector<1x256xf32>
      %287 = arith.addf %283, %286 : vector<1x256xf32>
      %288 = vector.extract_strided_slice %26 {offsets = [0, 50], sizes = [1, 256], strides = [1, 1]} : vector<1x358xf32> to vector<1x256xf32>
      %289 = vector.broadcast %99 : f32 to vector<1x256xf32>
      %290 = arith.mulf %289, %288 : vector<1x256xf32>
      %291 = arith.addf %287, %290 : vector<1x256xf32>
      %292 = vector.extract_strided_slice %26 {offsets = [0, 66], sizes = [1, 256], strides = [1, 1]} : vector<1x358xf32> to vector<1x256xf32>
      %293 = vector.broadcast %106 : f32 to vector<1x256xf32>
      %294 = arith.mulf %293, %292 : vector<1x256xf32>
      %295 = arith.addf %291, %294 : vector<1x256xf32>
      %296 = vector.extract_strided_slice %26 {offsets = [0, 82], sizes = [1, 256], strides = [1, 1]} : vector<1x358xf32> to vector<1x256xf32>
      %297 = vector.broadcast %113 : f32 to vector<1x256xf32>
      %298 = arith.mulf %297, %296 : vector<1x256xf32>
      %299 = arith.addf %295, %298 : vector<1x256xf32>
      %300 = vector.extract_strided_slice %26 {offsets = [0, 98], sizes = [1, 256], strides = [1, 1]} : vector<1x358xf32> to vector<1x256xf32>
      %301 = vector.broadcast %120 : f32 to vector<1x256xf32>
      %302 = arith.mulf %301, %300 : vector<1x256xf32>
      %303 = arith.addf %299, %302 : vector<1x256xf32>
      %304 = arith.mulf %246, %303 : vector<1x256xf32>
      %305 = arith.addf %245, %304 : vector<1x256xf32>
      %c3_38 = arith.constant 3 : index
      %c0_39 = arith.constant 0 : index
      %306 = vector.load %arg3[%c3_38, %c0_39] : memref<7x256xf32, #tpu.memory_space<vmem>>, vector<1x256xf32>
      %cst_40 = arith.constant 0.000000e+00 : f32
      %307 = vector.broadcast %cst_40 : f32 to vector<1x256xf32>
      %308 = vector.extract_strided_slice %25 {offsets = [0, 3], sizes = [1, 256], strides = [1, 1]} : vector<1x358xf32> to vector<1x256xf32>
      %309 = vector.broadcast %30 : f32 to vector<1x256xf32>
      %310 = arith.mulf %309, %308 : vector<1x256xf32>
      %311 = arith.addf %307, %310 : vector<1x256xf32>
      %312 = vector.extract_strided_slice %25 {offsets = [0, 19], sizes = [1, 256], strides = [1, 1]} : vector<1x358xf32> to vector<1x256xf32>
      %313 = vector.broadcast %37 : f32 to vector<1x256xf32>
      %314 = arith.mulf %313, %312 : vector<1x256xf32>
      %315 = arith.addf %311, %314 : vector<1x256xf32>
      %316 = vector.extract_strided_slice %25 {offsets = [0, 35], sizes = [1, 256], strides = [1, 1]} : vector<1x358xf32> to vector<1x256xf32>
      %317 = vector.broadcast %44 : f32 to vector<1x256xf32>
      %318 = arith.mulf %317, %316 : vector<1x256xf32>
      %319 = arith.addf %315, %318 : vector<1x256xf32>
      %320 = vector.extract_strided_slice %25 {offsets = [0, 51], sizes = [1, 256], strides = [1, 1]} : vector<1x358xf32> to vector<1x256xf32>
      %321 = vector.broadcast %51 : f32 to vector<1x256xf32>
      %322 = arith.mulf %321, %320 : vector<1x256xf32>
      %323 = arith.addf %319, %322 : vector<1x256xf32>
      %324 = vector.extract_strided_slice %25 {offsets = [0, 67], sizes = [1, 256], strides = [1, 1]} : vector<1x358xf32> to vector<1x256xf32>
      %325 = vector.broadcast %58 : f32 to vector<1x256xf32>
      %326 = arith.mulf %325, %324 : vector<1x256xf32>
      %327 = arith.addf %323, %326 : vector<1x256xf32>
      %328 = vector.extract_strided_slice %25 {offsets = [0, 83], sizes = [1, 256], strides = [1, 1]} : vector<1x358xf32> to vector<1x256xf32>
      %329 = vector.broadcast %65 : f32 to vector<1x256xf32>
      %330 = arith.mulf %329, %328 : vector<1x256xf32>
      %331 = arith.addf %327, %330 : vector<1x256xf32>
      %332 = vector.extract_strided_slice %25 {offsets = [0, 99], sizes = [1, 256], strides = [1, 1]} : vector<1x358xf32> to vector<1x256xf32>
      %333 = vector.broadcast %72 : f32 to vector<1x256xf32>
      %334 = arith.mulf %333, %332 : vector<1x256xf32>
      %335 = arith.addf %331, %334 : vector<1x256xf32>
      %336 = vector.extract_strided_slice %26 {offsets = [0, 3], sizes = [1, 256], strides = [1, 1]} : vector<1x358xf32> to vector<1x256xf32>
      %337 = vector.broadcast %79 : f32 to vector<1x256xf32>
      %338 = arith.mulf %337, %336 : vector<1x256xf32>
      %339 = arith.addf %335, %338 : vector<1x256xf32>
      %340 = vector.extract_strided_slice %26 {offsets = [0, 19], sizes = [1, 256], strides = [1, 1]} : vector<1x358xf32> to vector<1x256xf32>
      %341 = vector.broadcast %86 : f32 to vector<1x256xf32>
      %342 = arith.mulf %341, %340 : vector<1x256xf32>
      %343 = arith.addf %339, %342 : vector<1x256xf32>
      %344 = vector.extract_strided_slice %26 {offsets = [0, 35], sizes = [1, 256], strides = [1, 1]} : vector<1x358xf32> to vector<1x256xf32>
      %345 = vector.broadcast %93 : f32 to vector<1x256xf32>
      %346 = arith.mulf %345, %344 : vector<1x256xf32>
      %347 = arith.addf %343, %346 : vector<1x256xf32>
      %348 = vector.extract_strided_slice %26 {offsets = [0, 51], sizes = [1, 256], strides = [1, 1]} : vector<1x358xf32> to vector<1x256xf32>
      %349 = vector.broadcast %100 : f32 to vector<1x256xf32>
      %350 = arith.mulf %349, %348 : vector<1x256xf32>
      %351 = arith.addf %347, %350 : vector<1x256xf32>
      %352 = vector.extract_strided_slice %26 {offsets = [0, 67], sizes = [1, 256], strides = [1, 1]} : vector<1x358xf32> to vector<1x256xf32>
      %353 = vector.broadcast %107 : f32 to vector<1x256xf32>
      %354 = arith.mulf %353, %352 : vector<1x256xf32>
      %355 = arith.addf %351, %354 : vector<1x256xf32>
      %356 = vector.extract_strided_slice %26 {offsets = [0, 83], sizes = [1, 256], strides = [1, 1]} : vector<1x358xf32> to vector<1x256xf32>
      %357 = vector.broadcast %114 : f32 to vector<1x256xf32>
      %358 = arith.mulf %357, %356 : vector<1x256xf32>
      %359 = arith.addf %355, %358 : vector<1x256xf32>
      %360 = vector.extract_strided_slice %26 {offsets = [0, 99], sizes = [1, 256], strides = [1, 1]} : vector<1x358xf32> to vector<1x256xf32>
      %361 = vector.broadcast %121 : f32 to vector<1x256xf32>
      %362 = arith.mulf %361, %360 : vector<1x256xf32>
      %363 = arith.addf %359, %362 : vector<1x256xf32>
      %364 = arith.mulf %306, %363 : vector<1x256xf32>
      %365 = arith.addf %305, %364 : vector<1x256xf32>
      %c4_41 = arith.constant 4 : index
      %c0_42 = arith.constant 0 : index
      %366 = vector.load %arg3[%c4_41, %c0_42] : memref<7x256xf32, #tpu.memory_space<vmem>>, vector<1x256xf32>
      %cst_43 = arith.constant 0.000000e+00 : f32
      %367 = vector.broadcast %cst_43 : f32 to vector<1x256xf32>
      %368 = vector.extract_strided_slice %25 {offsets = [0, 4], sizes = [1, 256], strides = [1, 1]} : vector<1x358xf32> to vector<1x256xf32>
      %369 = vector.broadcast %31 : f32 to vector<1x256xf32>
      %370 = arith.mulf %369, %368 : vector<1x256xf32>
      %371 = arith.addf %367, %370 : vector<1x256xf32>
      %372 = vector.extract_strided_slice %25 {offsets = [0, 20], sizes = [1, 256], strides = [1, 1]} : vector<1x358xf32> to vector<1x256xf32>
      %373 = vector.broadcast %38 : f32 to vector<1x256xf32>
      %374 = arith.mulf %373, %372 : vector<1x256xf32>
      %375 = arith.addf %371, %374 : vector<1x256xf32>
      %376 = vector.extract_strided_slice %25 {offsets = [0, 36], sizes = [1, 256], strides = [1, 1]} : vector<1x358xf32> to vector<1x256xf32>
      %377 = vector.broadcast %45 : f32 to vector<1x256xf32>
      %378 = arith.mulf %377, %376 : vector<1x256xf32>
      %379 = arith.addf %375, %378 : vector<1x256xf32>
      %380 = vector.extract_strided_slice %25 {offsets = [0, 52], sizes = [1, 256], strides = [1, 1]} : vector<1x358xf32> to vector<1x256xf32>
      %381 = vector.broadcast %52 : f32 to vector<1x256xf32>
      %382 = arith.mulf %381, %380 : vector<1x256xf32>
      %383 = arith.addf %379, %382 : vector<1x256xf32>
      %384 = vector.extract_strided_slice %25 {offsets = [0, 68], sizes = [1, 256], strides = [1, 1]} : vector<1x358xf32> to vector<1x256xf32>
      %385 = vector.broadcast %59 : f32 to vector<1x256xf32>
      %386 = arith.mulf %385, %384 : vector<1x256xf32>
      %387 = arith.addf %383, %386 : vector<1x256xf32>
      %388 = vector.extract_strided_slice %25 {offsets = [0, 84], sizes = [1, 256], strides = [1, 1]} : vector<1x358xf32> to vector<1x256xf32>
      %389 = vector.broadcast %66 : f32 to vector<1x256xf32>
      %390 = arith.mulf %389, %388 : vector<1x256xf32>
      %391 = arith.addf %387, %390 : vector<1x256xf32>
      %392 = vector.extract_strided_slice %25 {offsets = [0, 100], sizes = [1, 256], strides = [1, 1]} : vector<1x358xf32> to vector<1x256xf32>
      %393 = vector.broadcast %73 : f32 to vector<1x256xf32>
      %394 = arith.mulf %393, %392 : vector<1x256xf32>
      %395 = arith.addf %391, %394 : vector<1x256xf32>
      %396 = vector.extract_strided_slice %26 {offsets = [0, 4], sizes = [1, 256], strides = [1, 1]} : vector<1x358xf32> to vector<1x256xf32>
      %397 = vector.broadcast %80 : f32 to vector<1x256xf32>
      %398 = arith.mulf %397, %396 : vector<1x256xf32>
      %399 = arith.addf %395, %398 : vector<1x256xf32>
      %400 = vector.extract_strided_slice %26 {offsets = [0, 20], sizes = [1, 256], strides = [1, 1]} : vector<1x358xf32> to vector<1x256xf32>
      %401 = vector.broadcast %87 : f32 to vector<1x256xf32>
      %402 = arith.mulf %401, %400 : vector<1x256xf32>
      %403 = arith.addf %399, %402 : vector<1x256xf32>
      %404 = vector.extract_strided_slice %26 {offsets = [0, 36], sizes = [1, 256], strides = [1, 1]} : vector<1x358xf32> to vector<1x256xf32>
      %405 = vector.broadcast %94 : f32 to vector<1x256xf32>
      %406 = arith.mulf %405, %404 : vector<1x256xf32>
      %407 = arith.addf %403, %406 : vector<1x256xf32>
      %408 = vector.extract_strided_slice %26 {offsets = [0, 52], sizes = [1, 256], strides = [1, 1]} : vector<1x358xf32> to vector<1x256xf32>
      %409 = vector.broadcast %101 : f32 to vector<1x256xf32>
      %410 = arith.mulf %409, %408 : vector<1x256xf32>
      %411 = arith.addf %407, %410 : vector<1x256xf32>
      %412 = vector.extract_strided_slice %26 {offsets = [0, 68], sizes = [1, 256], strides = [1, 1]} : vector<1x358xf32> to vector<1x256xf32>
      %413 = vector.broadcast %108 : f32 to vector<1x256xf32>
      %414 = arith.mulf %413, %412 : vector<1x256xf32>
      %415 = arith.addf %411, %414 : vector<1x256xf32>
      %416 = vector.extract_strided_slice %26 {offsets = [0, 84], sizes = [1, 256], strides = [1, 1]} : vector<1x358xf32> to vector<1x256xf32>
      %417 = vector.broadcast %115 : f32 to vector<1x256xf32>
      %418 = arith.mulf %417, %416 : vector<1x256xf32>
      %419 = arith.addf %415, %418 : vector<1x256xf32>
      %420 = vector.extract_strided_slice %26 {offsets = [0, 100], sizes = [1, 256], strides = [1, 1]} : vector<1x358xf32> to vector<1x256xf32>
      %421 = vector.broadcast %122 : f32 to vector<1x256xf32>
      %422 = arith.mulf %421, %420 : vector<1x256xf32>
      %423 = arith.addf %419, %422 : vector<1x256xf32>
      %424 = arith.mulf %366, %423 : vector<1x256xf32>
      %425 = arith.addf %365, %424 : vector<1x256xf32>
      %c5_44 = arith.constant 5 : index
      %c0_45 = arith.constant 0 : index
      %426 = vector.load %arg3[%c5_44, %c0_45] : memref<7x256xf32, #tpu.memory_space<vmem>>, vector<1x256xf32>
      %cst_46 = arith.constant 0.000000e+00 : f32
      %427 = vector.broadcast %cst_46 : f32 to vector<1x256xf32>
      %428 = vector.extract_strided_slice %25 {offsets = [0, 5], sizes = [1, 256], strides = [1, 1]} : vector<1x358xf32> to vector<1x256xf32>
      %429 = vector.broadcast %32 : f32 to vector<1x256xf32>
      %430 = arith.mulf %429, %428 : vector<1x256xf32>
      %431 = arith.addf %427, %430 : vector<1x256xf32>
      %432 = vector.extract_strided_slice %25 {offsets = [0, 21], sizes = [1, 256], strides = [1, 1]} : vector<1x358xf32> to vector<1x256xf32>
      %433 = vector.broadcast %39 : f32 to vector<1x256xf32>
      %434 = arith.mulf %433, %432 : vector<1x256xf32>
      %435 = arith.addf %431, %434 : vector<1x256xf32>
      %436 = vector.extract_strided_slice %25 {offsets = [0, 37], sizes = [1, 256], strides = [1, 1]} : vector<1x358xf32> to vector<1x256xf32>
      %437 = vector.broadcast %46 : f32 to vector<1x256xf32>
      %438 = arith.mulf %437, %436 : vector<1x256xf32>
      %439 = arith.addf %435, %438 : vector<1x256xf32>
      %440 = vector.extract_strided_slice %25 {offsets = [0, 53], sizes = [1, 256], strides = [1, 1]} : vector<1x358xf32> to vector<1x256xf32>
      %441 = vector.broadcast %53 : f32 to vector<1x256xf32>
      %442 = arith.mulf %441, %440 : vector<1x256xf32>
      %443 = arith.addf %439, %442 : vector<1x256xf32>
      %444 = vector.extract_strided_slice %25 {offsets = [0, 69], sizes = [1, 256], strides = [1, 1]} : vector<1x358xf32> to vector<1x256xf32>
      %445 = vector.broadcast %60 : f32 to vector<1x256xf32>
      %446 = arith.mulf %445, %444 : vector<1x256xf32>
      %447 = arith.addf %443, %446 : vector<1x256xf32>
      %448 = vector.extract_strided_slice %25 {offsets = [0, 85], sizes = [1, 256], strides = [1, 1]} : vector<1x358xf32> to vector<1x256xf32>
      %449 = vector.broadcast %67 : f32 to vector<1x256xf32>
      %450 = arith.mulf %449, %448 : vector<1x256xf32>
      %451 = arith.addf %447, %450 : vector<1x256xf32>
      %452 = vector.extract_strided_slice %25 {offsets = [0, 101], sizes = [1, 256], strides = [1, 1]} : vector<1x358xf32> to vector<1x256xf32>
      %453 = vector.broadcast %74 : f32 to vector<1x256xf32>
      %454 = arith.mulf %453, %452 : vector<1x256xf32>
      %455 = arith.addf %451, %454 : vector<1x256xf32>
      %456 = vector.extract_strided_slice %26 {offsets = [0, 5], sizes = [1, 256], strides = [1, 1]} : vector<1x358xf32> to vector<1x256xf32>
      %457 = vector.broadcast %81 : f32 to vector<1x256xf32>
      %458 = arith.mulf %457, %456 : vector<1x256xf32>
      %459 = arith.addf %455, %458 : vector<1x256xf32>
      %460 = vector.extract_strided_slice %26 {offsets = [0, 21], sizes = [1, 256], strides = [1, 1]} : vector<1x358xf32> to vector<1x256xf32>
      %461 = vector.broadcast %88 : f32 to vector<1x256xf32>
      %462 = arith.mulf %461, %460 : vector<1x256xf32>
      %463 = arith.addf %459, %462 : vector<1x256xf32>
      %464 = vector.extract_strided_slice %26 {offsets = [0, 37], sizes = [1, 256], strides = [1, 1]} : vector<1x358xf32> to vector<1x256xf32>
      %465 = vector.broadcast %95 : f32 to vector<1x256xf32>
      %466 = arith.mulf %465, %464 : vector<1x256xf32>
      %467 = arith.addf %463, %466 : vector<1x256xf32>
      %468 = vector.extract_strided_slice %26 {offsets = [0, 53], sizes = [1, 256], strides = [1, 1]} : vector<1x358xf32> to vector<1x256xf32>
      %469 = vector.broadcast %102 : f32 to vector<1x256xf32>
      %470 = arith.mulf %469, %468 : vector<1x256xf32>
      %471 = arith.addf %467, %470 : vector<1x256xf32>
      %472 = vector.extract_strided_slice %26 {offsets = [0, 69], sizes = [1, 256], strides = [1, 1]} : vector<1x358xf32> to vector<1x256xf32>
      %473 = vector.broadcast %109 : f32 to vector<1x256xf32>
      %474 = arith.mulf %473, %472 : vector<1x256xf32>
      %475 = arith.addf %471, %474 : vector<1x256xf32>
      %476 = vector.extract_strided_slice %26 {offsets = [0, 85], sizes = [1, 256], strides = [1, 1]} : vector<1x358xf32> to vector<1x256xf32>
      %477 = vector.broadcast %116 : f32 to vector<1x256xf32>
      %478 = arith.mulf %477, %476 : vector<1x256xf32>
      %479 = arith.addf %475, %478 : vector<1x256xf32>
      %480 = vector.extract_strided_slice %26 {offsets = [0, 101], sizes = [1, 256], strides = [1, 1]} : vector<1x358xf32> to vector<1x256xf32>
      %481 = vector.broadcast %123 : f32 to vector<1x256xf32>
      %482 = arith.mulf %481, %480 : vector<1x256xf32>
      %483 = arith.addf %479, %482 : vector<1x256xf32>
      %484 = arith.mulf %426, %483 : vector<1x256xf32>
      %485 = arith.addf %425, %484 : vector<1x256xf32>
      %c6_47 = arith.constant 6 : index
      %c0_48 = arith.constant 0 : index
      %486 = vector.load %arg3[%c6_47, %c0_48] : memref<7x256xf32, #tpu.memory_space<vmem>>, vector<1x256xf32>
      %cst_49 = arith.constant 0.000000e+00 : f32
      %487 = vector.broadcast %cst_49 : f32 to vector<1x256xf32>
      %488 = vector.extract_strided_slice %25 {offsets = [0, 6], sizes = [1, 256], strides = [1, 1]} : vector<1x358xf32> to vector<1x256xf32>
      %489 = vector.broadcast %33 : f32 to vector<1x256xf32>
      %490 = arith.mulf %489, %488 : vector<1x256xf32>
      %491 = arith.addf %487, %490 : vector<1x256xf32>
      %492 = vector.extract_strided_slice %25 {offsets = [0, 22], sizes = [1, 256], strides = [1, 1]} : vector<1x358xf32> to vector<1x256xf32>
      %493 = vector.broadcast %40 : f32 to vector<1x256xf32>
      %494 = arith.mulf %493, %492 : vector<1x256xf32>
      %495 = arith.addf %491, %494 : vector<1x256xf32>
      %496 = vector.extract_strided_slice %25 {offsets = [0, 38], sizes = [1, 256], strides = [1, 1]} : vector<1x358xf32> to vector<1x256xf32>
      %497 = vector.broadcast %47 : f32 to vector<1x256xf32>
      %498 = arith.mulf %497, %496 : vector<1x256xf32>
      %499 = arith.addf %495, %498 : vector<1x256xf32>
      %500 = vector.extract_strided_slice %25 {offsets = [0, 54], sizes = [1, 256], strides = [1, 1]} : vector<1x358xf32> to vector<1x256xf32>
      %501 = vector.broadcast %54 : f32 to vector<1x256xf32>
      %502 = arith.mulf %501, %500 : vector<1x256xf32>
      %503 = arith.addf %499, %502 : vector<1x256xf32>
      %504 = vector.extract_strided_slice %25 {offsets = [0, 70], sizes = [1, 256], strides = [1, 1]} : vector<1x358xf32> to vector<1x256xf32>
      %505 = vector.broadcast %61 : f32 to vector<1x256xf32>
      %506 = arith.mulf %505, %504 : vector<1x256xf32>
      %507 = arith.addf %503, %506 : vector<1x256xf32>
      %508 = vector.extract_strided_slice %25 {offsets = [0, 86], sizes = [1, 256], strides = [1, 1]} : vector<1x358xf32> to vector<1x256xf32>
      %509 = vector.broadcast %68 : f32 to vector<1x256xf32>
      %510 = arith.mulf %509, %508 : vector<1x256xf32>
      %511 = arith.addf %507, %510 : vector<1x256xf32>
      %512 = vector.extract_strided_slice %25 {offsets = [0, 102], sizes = [1, 256], strides = [1, 1]} : vector<1x358xf32> to vector<1x256xf32>
      %513 = vector.broadcast %75 : f32 to vector<1x256xf32>
      %514 = arith.mulf %513, %512 : vector<1x256xf32>
      %515 = arith.addf %511, %514 : vector<1x256xf32>
      %516 = vector.extract_strided_slice %26 {offsets = [0, 6], sizes = [1, 256], strides = [1, 1]} : vector<1x358xf32> to vector<1x256xf32>
      %517 = vector.broadcast %82 : f32 to vector<1x256xf32>
      %518 = arith.mulf %517, %516 : vector<1x256xf32>
      %519 = arith.addf %515, %518 : vector<1x256xf32>
      %520 = vector.extract_strided_slice %26 {offsets = [0, 22], sizes = [1, 256], strides = [1, 1]} : vector<1x358xf32> to vector<1x256xf32>
      %521 = vector.broadcast %89 : f32 to vector<1x256xf32>
      %522 = arith.mulf %521, %520 : vector<1x256xf32>
      %523 = arith.addf %519, %522 : vector<1x256xf32>
      %524 = vector.extract_strided_slice %26 {offsets = [0, 38], sizes = [1, 256], strides = [1, 1]} : vector<1x358xf32> to vector<1x256xf32>
      %525 = vector.broadcast %96 : f32 to vector<1x256xf32>
      %526 = arith.mulf %525, %524 : vector<1x256xf32>
      %527 = arith.addf %523, %526 : vector<1x256xf32>
      %528 = vector.extract_strided_slice %26 {offsets = [0, 54], sizes = [1, 256], strides = [1, 1]} : vector<1x358xf32> to vector<1x256xf32>
      %529 = vector.broadcast %103 : f32 to vector<1x256xf32>
      %530 = arith.mulf %529, %528 : vector<1x256xf32>
      %531 = arith.addf %527, %530 : vector<1x256xf32>
      %532 = vector.extract_strided_slice %26 {offsets = [0, 70], sizes = [1, 256], strides = [1, 1]} : vector<1x358xf32> to vector<1x256xf32>
      %533 = vector.broadcast %110 : f32 to vector<1x256xf32>
      %534 = arith.mulf %533, %532 : vector<1x256xf32>
      %535 = arith.addf %531, %534 : vector<1x256xf32>
      %536 = vector.extract_strided_slice %26 {offsets = [0, 86], sizes = [1, 256], strides = [1, 1]} : vector<1x358xf32> to vector<1x256xf32>
      %537 = vector.broadcast %117 : f32 to vector<1x256xf32>
      %538 = arith.mulf %537, %536 : vector<1x256xf32>
      %539 = arith.addf %535, %538 : vector<1x256xf32>
      %540 = vector.extract_strided_slice %26 {offsets = [0, 102], sizes = [1, 256], strides = [1, 1]} : vector<1x358xf32> to vector<1x256xf32>
      %541 = vector.broadcast %124 : f32 to vector<1x256xf32>
      %542 = arith.mulf %541, %540 : vector<1x256xf32>
      %543 = arith.addf %539, %542 : vector<1x256xf32>
      %544 = arith.mulf %486, %543 : vector<1x256xf32>
      %545 = arith.addf %485, %544 : vector<1x256xf32>
      %546 = arith.negf %545 : vector<1x256xf32>
      %547 = math.exp %546 : vector<1x256xf32>
      %cst_50 = arith.constant 1.000000e+00 : f32
      %548 = vector.broadcast %cst_50 : f32 to vector<1x256xf32>
      %549 = arith.addf %548, %547 : vector<1x256xf32>
      %550 = arith.divf %548, %549 : vector<1x256xf32>
      %551 = vector.shape_cast %550 : vector<1x256xf32> to vector<1x1x256xf32>
      %c0_51 = arith.constant 0 : index
      %c0_52 = arith.constant 0 : index
      %c0_53 = arith.constant 0 : index
      %552 = vector.load %arg5[%c0_51, %c0_52, %c0_53] : memref<1x1x256xf32, #tpu.memory_space<vmem>>, vector<1x1x256xf32>
      tpu.vector_store %arg5[%c0_51, %c0_52, %c0_53], %551 {strides = array<i32>} : memref<1x1x256xf32, #tpu.memory_space<vmem>>, vector<1x1x256xf32>,
    } else {
    }
    return
  }
  func.func @transform_0(%arg0: i32, %arg1: i32) -> (i32, i32, i32) {
    %c0_i32 = arith.constant 0 : i32
    %c0_i32_0 = arith.constant 0 : i32
    return %arg0, %arg1, %c0_i32 : i32, i32, i32
  }
  func.func @transform_1(%arg0: i32, %arg1: i32) -> (i32, i32) {
    %c0_i32 = arith.constant 0 : i32
    %c0_i32_0 = arith.constant 0 : i32
    %c0_i32_1 = arith.constant 0 : i32
    return %c0_i32, %c0_i32_0 : i32, i32
  }
  func.func @transform_2(%arg0: i32, %arg1: i32) -> i32 {
    %c0_i32 = arith.constant 0 : i32
    %c0_i32_0 = arith.constant 0 : i32
    return %c0_i32 : i32
  }
  func.func @transform_3(%arg0: i32, %arg1: i32) -> (i32, i32, i32) {
    %c0_i32 = arith.constant 0 : i32
    %c0_i32_0 = arith.constant 0 : i32
    %c0_i32_1 = arith.constant 0 : i32
    return %arg0, %c0_i32, %c0_i32_0 : i32, i32, i32
  }
}

</mosaic_0001>

<bundles_post_ra>
// kernel: tpu_custom_call.1
= control target key start
LH: loop header
LB: loop body
LE: loop exit
PB: predicated region body
PF: predicated region fallthrough
CT: control target
= control target key end

     0   :  { %8 = vsyncpa [#allocation7], 0  ;;  %s2594_s0 = inlined_call_operand.hbm [shape: f32[2,4,256], index: 0, kind: input, shape index: {}]   ;;  %s2595_s1 = inlined_call_operand.hbm [shape: f32[7,256], index: 1, kind: input, shape index: {}]   ;;  %s2596_s2 = inlined_call_operand.vmem [shape: f32[98], index: 2, kind: input, shape index: {}]   ;;  %s2597_s3 = inlined_call_operand.hbm [shape: f32[2,1,256], index: 3, kind: output, shape index: {}]  }
   0x1   :  { %10 = vsyncpa [#allocation7 + $0x1], 0 }
   0x2   :  { %11 = vsyncpa [#allocation11], 0 }
   0x3   :  { %12 = vsyncpa [#allocation9], 0 }
   0x4   :  { %13 = vsyncpa [#allocation8], 0 }
   0x5   :  { %15 = vsyncpa [#allocation8 + $0x1], 0  ;;  %s1886_s12 = smov 0   ;;  %s1888_s13 = smov 0  }
   0x6   :  { %s1890_s14 = smov 0   ;;  %s1892_s15 = smov 0  }
   0x7   :  { %s1894_s16 = smov 0   ;;  %s1896_s17 = smov 0  }
   0x8 LB: > { %s1465_s18 = sadd.s32 4294967295, %s1848_s17   ;;  %s1466_s19 = sadd.s32 4294967294, %s1848_s17   ;;  %s1848_s17 = sphi %s1896_s17, %s21_s17   ;;  %s1844_s16 = sphi %s1894_s16, %s2613_s16   ;;  %s1840_s15 = sphi %s1892_s15, %s2612_s15   ;;  %s1836_s14 = sphi %s1890_s14, %s2611_s14   ;;  %s1832_s13 = sphi %s1888_s13, %s2610_s13   ;;  %s1828_s12 = sphi %s1886_s12, %s2609_s12  }
   0x9   : > { %p55_p0 = scmp.ne.s32.totalorder %s1832_s13, %s1828_s12  ;;  %p1920_p1 = scmp.eq.s32.totalorder %s1465_s18, 0 }
   0xa   : > { %p127_p2 = scmp.eq.s32.totalorder %s1466_s19, 1  ;;  %p1467_p4 = scmp.ge.s32.totalorder %s1848_s17, 1 }
   0xb   : > { %p1926_p3 = por %p1920_p1, %p55_p0  ;;  %p134_p6 = scmp.lt.s32.totalorder %s1848_s17, 3 }
   0xc   : > { %p1931_p5 = por %p127_p2, %p55_p0  ;;  %s146_s25 = sshll.u32 %s2595_s1, 4  ;;  %s147_s25 = int_to_ptr.hbm [resolvable:$true] %s146_s25 }
   0xd   : > { %p1939_p7 = pnand %p1467_p4, %p134_p6  ;;  %p1470_p8 = scmp.ge.s32.totalorder %s1848_s17, 2 }
   0xe   : > { %s1850_s27 = smov [#allocation10]   ;;  %s158_s4 = sshll.u32 %s2596_s2, 4  ;;  %s159_s4 = int_to_ptr.vmem [resolvable:$true] %s158_s4 }
   0xf   : > { %p1594_p9 = pneg %p1939_p7  ;;  %s148_s28 = sshll.u32 %s1850_s27, 4  ;;  %s149_s28 = int_to_ptr.vmem [resolvable:$true] %s148_s28 }
  0x10   : > { %s1851_s5 = smov [#allocation12]   ;;  %p121_p11 = scmp.eq.s32.totalorder %s1465_s18, 1 }
  0x11   : > { %p1595_p10 = pnand %p1594_p9, %p1920_p1  ;;  %s33_s6 = sadd.s32 1, %s1844_s16 }
  0x12   : > { %p35_p12 = scmp.ge.s32.totalorder %s33_s6, 2  ;;  %s42_s7 = sadd.s32 1, %s1836_s14 }
  0x13   : > { %1597 = dma.hbm_to_vmem [thread:$0]  (!%p1595_p10), %s147_s25, 256, %s149_s28, [#allocation11]  }
  0x14   : > { %1600 = dma.vmem_to_smem (!%p1595_p10), %s159_s4, 16, %s1851_s5, [#allocation9]  }
  0x15   : > { %p49_p13 = scmp.ne.s32.totalorder %s1836_s14, %s1832_s13  ;;  %p50_p0 = scmp.eq.s32.totalorder %s1848_s17, 0 }
  0x16   : > { %s2615_s6 = smov (%p35_p12, %s33_s6), 0  ;;  %p1611_p4 = scmp.lt.s32.totalorder %s1848_s17, 2 }
  0x17   : > { %p1958_p2 = por %p121_p11, %p49_p13  ;;  %s37_s9 = ssub.s32 %s1844_s16, %s2615_s6 }
  0x18   : > { %s169_s10 = sand.u32 1, %s1836_s14   ;;  %p40_p6 = scmp.eq.s32.totalorder %s37_s9, 0 }
  0x19   : > { %p51_p9 = por %p50_p0, %p49_p13  ;;  %s1471_s11 = sshll.u32 %s169_s10, 3 }
  0x1a   : > { %s1581_s18 = sshll.u32 %s1844_s16, 3  ;;  %s173_s28 = scalar_lea.vmem [#allocation6], %s1471_s11 }
  0x1b   : > { %s1968_s19 = scalar_select %p40_p6, %s1836_s14, %s42_s7  }
  0x1c   : > { %s180_s25 = scalar_lea.hbm %s2594_s0, %s1581_s18  ;;  %s184_s29 = sshll.u32 %s173_s28, 4  ;;  %s185_s29 = int_to_ptr.vmem [resolvable:$true] %s184_s29 }
  0x1d   : > { %s182_s27 = sshll.u32 %s180_s25, 4  ;;  %p1602_p10 = pnand %p1611_p4, %p51_p9  ;;  %s183_s27 = int_to_ptr.hbm [resolvable:$true] %s182_s27 }
  0x1e   : > { %s170_s30 = scalar_lea.sflag [#allocation7], %s169_s10  ;;  %193 = sbr.rel (%p1939_p7) target bundleno = 705 (0x2c1), region = 32 }
  0x1f   : > { %1604 = dma.hbm_to_vmem [thread:$0]  (!%p1602_p10), %s183_s27, 128, %s185_s29, %s170_s30  }
  0x20   : > { %s1978_s4 = sand.u32 (!%p1939_p7), 1, %s1832_s13  }
  0x21   : > { %s1475_s5 = sshll.u32 (!%p1939_p7), %s1978_s4, 3  ;;  %s196_s7 = scalar_lea.sflag (!%p1939_p7), [#allocation7], %s1978_s4 }
  0x22   : > { %s199_s9 = scalar_lea.vmem (!%p1939_p7), [#allocation6], %s1475_s5 }
  0x23   : > { %1811 = dma.done.wait (%p1926_p3), %s196_s7, 128  }
  0x24   : > { %1813 = vsyncadd (%p1926_p3), %s196_s7, 4294967168 }
  0x25   : > { %1815 = dma.done.wait (%p1920_p1), [#allocation11], 256  }
  0x26   : > { %1817 = vsyncadd (%p1920_p1), [#allocation11], 4294967040 }
  0x27   : > { %1819 = dma.done.wait (%p1920_p1), [#allocation9], 16  }
  0x28   : > { %1821 = vsyncadd (%p1920_p1), [#allocation9], 4294967280 }
  0x29   : > { %215 = sfence }
  0x2a   : > { %v234_v0 = vld [vmem:[%s199_s9] sm:$0xff]  ;;  %vm241_vm0 = vcmask 1043456   ;;  %v285_v5 = vlaneseq  ;;  %v1852_v10 = vmov 0.0   ;;  %vm282_vm2 = vcmask 1040384   ;;  %s1853_s20 = smov 51   ;;  %s1513_s21 = sld [smem:[#allocation12 + $0x23]] }
  0x2b   : > { %236 = vst [vmem:[#allocation1] ss:$2 sm:$0xff] %v234_v0  ;;  %vm336_vm6 = vcmask 416768   ;;  %s1499_s26 = sld [smem:[#allocation12 + $0x15]]  ;;  %s1854_s24 = smov 48   ;;  %vm461_vm8 = vcmask 916480  }
  0x2c   : > { %vm326_vm1 = vcmp.lt.s32.totalorder %v285_v5, 358  ;;  %vm1998_vm3 = vcmp.lt.s32.totalorder %v285_v5, 256  ;;  %vm2006_vm4 = vcmp.ge.s32.totalorder %v285_v5, 51  ;;  %vm2010_vm5 = vcmp.lt.s32.totalorder %v285_v5, 307  ;;  %s1485_s10 = sld [smem:[#allocation12 + $0x7]]  ;;  %s1855_s25 = smov 80  }
  0x2d   : > { %328 = vst.msk [vmem:[#allocation4] sm:$0x7] %vm326_vm1, %v1852_v10  ;;  %vm341_vm7 = vmand %vm2006_vm4, %vm2010_vm5  ;;  %s1493_s11 = sld [smem:[#allocation12 + $0xf]]  ;;  %s1856_s27 = smov 112   ;;  %vm471_vm9 = vcmask 785408   ;;  %vm481_vm10 = vcmask 654336  }
  0x2e   : > { %329 = vst.msk [vmem:[#allocation5] sm:$0x7] %vm326_vm1, %v1852_v10  ;;  %s1506_s18 = sld [smem:[#allocation12 + $0x1c]]  ;;  %s1857_s5 = smov 96   ;;  %vm491_vm11 = vcmask 523264   ;;  %vm501_vm12 = vcmask 392192  }
  0x2f   : > { %s1492_s23 = sld [smem:[#allocation12 + $0xe]]  ;;  %s1858_s7 = smov 64   ;;  %vm511_vm13 = vcmask 261120   ;;  %vm694_vm14 = vcmask 1039360   ;;  %vm819_vm15 = vcmask 1031168   ;;  %vm1069_vm1 = vcmask 1014784  }
  0x30   : > { %v495_v48 = vstv %s1513_s21  ;;  %s1514_s28 = sld [smem:[#allocation12 + $0x24]]  ;;  %vm1194_vm4 = vcmask 1006592  }
  0x31   : > { %v475_v49 = vstv %s1499_s26  ;;  %s1486_s29 = sld [smem:[#allocation12 + $0x8]]  ;;  %s1859_s26 = smov 32  }
  0x32   : > { %v237_v1 = vld.sshfl [vmem:[#allocation1] sm:$0xff pattern:$0x75316420]  ;;  %v238_v2 = vld.sshfl [vmem:[#allocation1 + $0x8] sm:$0xff pattern:$0x75316420]  ;;  %v455_v50 = vstv %s1485_s10 }
  0x33   : > { %v242_v3 = vsel %vm241_vm0, %v237_v1, 0.0  ;;  %v249_v4 = vsel %vm241_vm0, %v238_v2, 0.0  ;;  %256 = vst [vmem:[#allocation1] ss:$2 sm:$0xff] %v234_v0  ;;  %v588_v55 = vstv %s1493_s11  ;;  %s1520_s30 = sld [smem:[#allocation12 + $0x2a]] }
  0x34   : > { %v243_v6 = vrot.slane %v242_v3, 4  ;;  %v250_v7 = vrot.slane %v249_v4, 4  ;;  %v485_v56 = vstv %s1506_s18  ;;  %s1487_s9 = sld [smem:[#allocation12 + $0x9]] }
  0x35   : > { %v465_v57 = vstv %s1492_s23  ;;  %s1500_s21 = sld [smem:[#allocation12 + $0x16]] }
  0x36   : > { %v244_v8 = vadd.f32 %v243_v6, %v242_v3  ;;  %v251_v9 = vadd.f32 %v250_v7, %v249_v4  ;;  %v615_v61 = vstv %s1514_s28  ;;  %s1508_s10 = sld [smem:[#allocation12 + $0x1e]] }
  0x37   : > { %v579_v62 = vstv %s1486_s29  ;;  %s1501_s11 = sld [smem:[#allocation12 + $0x17]] }
  0x38   : > { %v245_v11 = vrot.slane %v244_v8, 2  ;;  %v252_v12 = vrot.slane %v251_v9, 2  ;;  %s1521_s18 = sld [smem:[#allocation12 + $0x2b]] }
  0x39   : > { %v505_v63 = vstv %s1520_s30  ;;  %s1502_s23 = sld [smem:[#allocation12 + $0x18]] }
  0x3a   : > { %v246_v13 = vadd.f32 %v245_v11, %v244_v8  ;;  %v253_v14 = vadd.f32 %v252_v12, %v251_v9  ;;  %v257_v15 = vld.sshfl [vmem:[#allocation1] sm:$0xff pattern:$0x75316420]  ;;  %v258_v16 = vld.sshfl [vmem:[#allocation1 + $0x8] sm:$0xff pattern:$0x75316420]  ;;  %v704_v3 = vstv %s1487_s9 }
  0x3b   : > { %v261_v17 = vsel %vm241_vm0, %v257_v15, -inf  ;;  %v268_v18 = vsel %vm241_vm0, %v258_v16, -inf  ;;  %v597_v5 = vstv %s1500_s21  ;;  %s1522_s28 = sld [smem:[#allocation12 + $0x2c]]  ;;  %vm944_vm0 = vcmask 1022976  }
  0x3c   : > { %v247_v19 = vrot.slane %v246_v13, 1  ;;  %v254_v20 = vrot.slane %v253_v14, 1  ;;  %v262_v21 = vrot.slane %v261_v17, 4  ;;  %v269_v22 = vrot.slane %v268_v18, 4  ;;  %s1494_s29 = sld [smem:[#allocation12 + $0x10]] }
  0x3d   : > { %v731_v9 = vstv %s1508_s10  ;;  %v722_v10 = vstv %s1501_s11  ;;  %s1490_s30 = sld [smem:[#allocation12 + $0xc]] }
  0x3e   : > { %v248_v23 = vadd.f32 %v247_v19, %v246_v13  ;;  %v255_v24 = vadd.f32 %v254_v20, %v253_v14  ;;  %v263_v25 = vmax.f32 %v261_v17, %v262_v21  ;;  %v270_v26 = vmax.f32 %v268_v18, %v269_v22  ;;  %s1495_s9 = sld [smem:[#allocation12 + $0x11]] }
  0x3f   : > { %v624_v11 = vstv %s1521_s18  ;;  %v847_v15 = vstv %s1502_s23  ;;  %s1497_s21 = sld [smem:[#allocation12 + $0x13]] }
  0x40   : > { %v281_v27 = vrot.slane %v255_v24, 7  ;;  %v264_v29 = vrot.slane %v263_v25, 2  ;;  %v271_v30 = vrot.slane %v270_v26, 2  ;;  %s1496_s10 = sld [smem:[#allocation12 + $0x12]] }
  0x41   : > { %v749_v16 = vstv %s1522_s28  ;;  %s1488_s11 = sld [smem:[#allocation12 + $0xa]] }
  0x42   : > { %v283_v31 = vsel %vm282_vm2, %v248_v23, %v281_v27  ;;  %v265_v32 = vmax.f32 %v263_v25, %v264_v29  ;;  %v272_v33 = vmax.f32 %v270_v26, %v271_v30  ;;  %v713_v17 = vstv %s1494_s29  ;;  %s1510_s18 = sld [smem:[#allocation12 + $0x20]] }
  0x43   : > { %289 = vst.msk [vmem:[#allocation2] sm:$0x3] %vm1998_vm3, %v283_v31  ;;  %v1079_v21 = vstv %s1490_s30  ;;  %s1503_s23 = sld [smem:[#allocation12 + $0x19]] }
  0x44   : > { %v266_v34 = vrot.slane %v265_v32, 1  ;;  %v273_v35 = vrot.slane %v272_v33, 1  ;;  %v838_v22 = vstv %s1495_s9  ;;  %s1489_s28 = sld [smem:[#allocation12 + $0xb]] }
  0x45   : > { %v1088_v27 = vstv %s1497_s21  ;;  %s1523_s29 = sld [smem:[#allocation12 + $0x2d]] }
  0x46   : > { %v267_v36 = vmax.f32 %v265_v32, %v266_v34  ;;  %v274_v37 = vmax.f32 %v272_v33, %v273_v35  ;;  %v963_v29 = vstv %s1496_s10  ;;  %s1516_s30 = sld [smem:[#allocation12 + $0x26]] }
  0x47   : > { %v829_v30 = vstv %s1488_s11  ;;  %s1509_s9 = sld [smem:[#allocation12 + $0x1f]] }
  0x48   : > { %v292_v38 = vrot.slane %v274_v37, 7  ;;  %v981_v34 = vstv %s1510_s18  ;;  %s1498_s21 = sld [smem:[#allocation12 + $0x14]] }
  0x49   : > { %v972_v35 = vstv %s1503_s23  ;;  %s1491_s10 = sld [smem:[#allocation12 + $0xd]] }
  0x4a   : > { %v330_v39 = vld [vmem:[#allocation2] sm:$0x3]  ;;  %v293_v40 = vsel %vm282_vm2, %v267_v36, %v292_v38  ;;  %v954_v36 = vstv %s1489_s28  ;;  %s1512_s11 = sld [smem:[#allocation12 + $0x22]]  ;;  %vm1319_vm2 = vcmask 998400  }
  0x4b   : > { %v331_v41 = vmul.f32 0.25, %v330_v39  ;;  %295 = vst.msk [vmem:[#allocation3] sm:$0x3] %vm1998_vm3, %v293_v40  ;;  %s1511_s18 = sld [smem:[#allocation12 + $0x21]] }
  0x4c   : > { %s1504_s23 = sld [smem:[#allocation12 + $0x1a]] }
  0x4d   : > { %333 = vrot.lane.b32.xlu0 %v331_v41, %s1853_s20  ;;  %s1519_s28 = sld [smem:[#allocation12 + $0x29]] }
  0x4f   : > { %v1204_v43 = vstv %s1491_s10  ;;  %s1479_s10 = sld [smem:[#allocation12 + $0x1]] }
  0x52   : > { %v343_v42 = vld [vmem:[#allocation3] sm:$0x3] }
  0x55   : > { %345 = vrot.lane.b32.xlu0 %v343_v42, %s1853_s20  ;;  %s1507_s20 = sld [smem:[#allocation12 + $0x1d]]  ;;  %v874_v42 = vstv %s1523_s29 }
  0x56   : > { %s1518_s29 = sld [smem:[#allocation12 + $0x28]] }
  0x5b   : > { %v606_v4 = vstv %s1507_s20  ;;  %s1515_s20 = sld [smem:[#allocation12 + $0x25]] }
  0x61   : > { %v740_v23 = vstv %s1515_s20  ;;  %s1505_s20 = sld [smem:[#allocation12 + $0x1b]] }
  0xbf   : > { %v334_v45 = vpop.permute.xlu0 %333 }
  0xc0   : > { %v335_v46 = vrot.slane %v334_v45, 7 }
  0xc2   : > { %v337_v47 = vsel %vm336_vm6, %v335_v46, %v334_v45  ;;  %v865_v45 = vstv %s1516_s30  ;;  %v856_v46 = vstv %s1509_s9  ;;  %s1517_s30 = sld [smem:[#allocation12 + $0x27]] }
  0xc3   : > { %342 = vst.msk [vmem:[#allocation4] sm:$0x7] %vm341_vm7, %v337_v47  ;;  %s1526_s9 = sld [smem:[#allocation12 + $0x30]] }
  0xc7   : > { %v346_v40 = vpop.permute.xlu0 %345 }
  0xc8   : > { %v347_v41 = vrot.slane %v346_v40, 7 }
  0xca   : > { %v2024_v51 = vld [vmem:[#allocation4] sm:$0x7]  ;;  %v348_v47 = vsel %vm336_vm6, %v347_v41, %v346_v40 }
  0xcb   : > { %v496_v52 = vmul.f32 %v495_v48, %v2024_v51  ;;  %v476_v53 = vmul.f32 %v475_v49, %v2024_v51  ;;  %v456_v54 = vmul.f32 %v455_v50, %v2024_v51  ;;  %v589_v58 = vmul.f32 %v588_v55, %v2024_v51  ;;  %350 = vst.msk [vmem:[#allocation5] sm:$0x7] %vm341_vm7, %v348_v47 }
  0xcc   : > { %v486_v59 = vmul.f32 %v485_v56, %v2024_v51  ;;  %v466_v60 = vmul.f32 %v465_v57, %v2024_v51  ;;  %v616_v0 = vmul.f32 %v615_v61, %v2024_v51  ;;  %v580_v1 = vmul.f32 %v579_v62, %v2024_v51 }
  0xcd   : > { %498 = vrot.lane.b32.xlu0 %v496_v52, %s1854_s24  ;;  %478 = vrot.lane.b32.xlu2 %v476_v53, %s1855_s25  ;;  %v506_v2 = vmul.f32 %v505_v63, %v2024_v51  ;;  %v705_v6 = vmul.f32 %v704_v3, %v2024_v51  ;;  %v607_v7 = vmul.f32 %v606_v4, %v2024_v51  ;;  %v1222_v52 = vstv %s1505_s20  ;;  %s1525_s20 = sld [smem:[#allocation12 + $0x2f]] }
  0xce   : > { %458 = vrot.lane.b32.xlu1 %v456_v54, %s1856_s27  ;;  %v598_v8 = vmul.f32 %v597_v5, %v2024_v51  ;;  %v732_v12 = vmul.f32 %v731_v9, %v2024_v51  ;;  %v723_v13 = vmul.f32 %v722_v10, %v2024_v51  ;;  %v625_v14 = vmul.f32 %v624_v11, %v2024_v51 }
  0xcf   : > { %v848_v18 = vmul.f32 %v847_v15, %v2024_v51  ;;  %v750_v19 = vmul.f32 %v749_v16, %v2024_v51  ;;  %v714_v20 = vmul.f32 %v713_v17, %v2024_v51  ;;  %v1080_v24 = vmul.f32 %v1079_v21, %v2024_v51 }
  0xd0   : > { %v839_v25 = vmul.f32 %v838_v22, %v2024_v51  ;;  %v741_v26 = vmul.f32 %v740_v23, %v2024_v51  ;;  %v1089_v31 = vmul.f32 %v1088_v27, %v2024_v51  ;;  %v964_v32 = vmul.f32 %v963_v29, %v2024_v51 }
  0xd1   : > { %v830_v33 = vmul.f32 %v829_v30, %v2024_v51  ;;  %v982_v37 = vmul.f32 %v981_v34, %v2024_v51  ;;  %v973_v38 = vmul.f32 %v972_v35, %v2024_v51  ;;  %v955_v39 = vmul.f32 %v954_v36, %v2024_v51 }
  0xd2   : > { %v875_v48 = vmul.f32 %v874_v42, %v2024_v51  ;;  %v866_v49 = vmul.f32 %v865_v45, %v2024_v51  ;;  %v857_v50 = vmul.f32 %v856_v46, %v2024_v51  ;;  %v1213_v53 = vstv %s1498_s21  ;;  %s1524_s21 = sld [smem:[#allocation12 + $0x2e]] }
  0xd3   : > { %v1223_v44 = vmul.f32 %v1222_v52, %v2024_v51  ;;  %v1214_v54 = vmul.f32 %v1213_v53, %v2024_v51  ;;  %v1205_v55 = vmul.f32 %v1204_v43, %v2024_v51  ;;  %v1231_v56 = vstv %s1512_s11  ;;  %s1541_s11 = sld [smem:[#allocation12 + $0x3f]] }
  0xd4   : > { %v1106_v57 = vstv %s1511_s18  ;;  %v1240_v63 = vstv %s1519_s28  ;;  %s1534_s18 = sld [smem:[#allocation12 + $0x38]] }
  0xd5   : > { %591 = vrot.lane.b32.xlu0 %v589_v58, %s1857_s5  ;;  %488 = vrot.lane.b32.xlu2 %v486_v59, %s1858_s7  ;;  %v1097_v58 = vstv %s1504_s23  ;;  %v1232_v59 = vmul.f32 %v1231_v56, %v2024_v51  ;;  %s1548_s23 = sld [smem:[#allocation12 + $0x46]] }
  0xd6   : > { %468 = vrot.lane.b32.xlu1 %v466_v60, %s1857_s5  ;;  %v1107_v60 = vmul.f32 %v1106_v57, %v2024_v51  ;;  %v1098_v61 = vmul.f32 %v1097_v58, %v2024_v51  ;;  %s2120_s28 = sld [smem:[#allocation12]] }
  0xd9   : > { %v527_v16 = vstv %s1541_s11  ;;  %s2149_s11 = sld [smem:[#allocation12 + $0x5c]] }
  0xda   : > { %v518_v17 = vstv %s1534_s18  ;;  %s2154_s18 = sld [smem:[#allocation12 + $0x55]] }
  0xdd   : > { %618 = vrot.lane.b32.xlu0 %v616_v0, %s1854_s24  ;;  %582 = vrot.lane.b32.xlu2 %v580_v1, %s1856_s27  ;;  %v1115_v0 = vstv %s1518_s29  ;;  %v990_v1 = vstv %s1517_s30  ;;  %s1562_s29 = sld [smem:[#allocation12 + $0x54]] }
  0xde   : > { %508 = vrot.lane.b32.xlu1 %v506_v2, %s1859_s26  ;;  %v1241_v2 = vmul.f32 %v1240_v63, %v2024_v51  ;;  %v1116_v3 = vmul.f32 %v1115_v0, %v2024_v51  ;;  %v991_v4 = vmul.f32 %v990_v1, %v2024_v51  ;;  %s1555_s30 = sld [smem:[#allocation12 + $0x4d]] }
  0xe3   : > { %v554_v30 = vstv %s1562_s29  ;;  %s2174_s29 = sld [smem:[#allocation12 + $0x2]] }
  0xe5   : > { %707 = vrot.lane.b32.xlu0 %v705_v6, %s1856_s27  ;;  %609 = vrot.lane.b32.xlu2 %v607_v7, %s1858_s7  ;;  %v1249_v6 = vstv %s1526_s9  ;;  %v1124_v7 = vstv %s1525_s20  ;;  %s1569_s9 = sld [smem:[#allocation12 + $0x5b]] }
  0xe6   : > { %600 = vrot.lane.b32.xlu1 %v598_v8, %s1855_s25  ;;  %v999_v8 = vstv %s1524_s21  ;;  %v1250_v9 = vmul.f32 %v1249_v6, %v2024_v51  ;;  %v1125_v10 = vmul.f32 %v1124_v7, %v2024_v51  ;;  %s2135_s20 = sld [smem:[#allocation12 + $0x40]]  ;;  %v681_v7 = vstv %s2149_s11 }
  0xe7   : > { %v1000_v11 = vmul.f32 %v999_v8, %v2024_v51  ;;  %s2137_s21 = sld [smem:[#allocation12 + $0x39]] }
  0xe8   : > { %s2210_s11 = sld [smem:[#allocation12 + $0x5d]] }
  0xec   : > { %v645_v42 = vstv %s2135_s20  ;;  %s2188_s20 = sld [smem:[#allocation12 + $0x41]] }
  0xed   : > { %734 = vrot.lane.b32.xlu0 %v732_v12, %s1858_s7  ;;  %725 = vrot.lane.b32.xlu2 %v723_v13, %s1855_s25  ;;  %v576_v12 = vstv %s1479_s10  ;;  %s2139_s10 = sld [smem:[#allocation12 + $0x47]]  ;;  %v636_v47 = vstv %s2137_s21 }
  0xee   : > { %627 = vrot.lane.b32.xlu1 %v625_v14, %s1859_s26  ;;  %v2122_v14 = vld [vmem:[#allocation5] sm:$0x7]  ;;  %s2200_s21 = sld [smem:[#allocation12 + $0x56]] }
  0xef   : > { %v528_v22 = vmul.f32 %v527_v16, %v2122_v14  ;;  %v519_v23 = vmul.f32 %v518_v17, %v2122_v14  ;;  %v555_v36 = vmul.f32 %v554_v30, %v2122_v14  ;;  %v646_v53 = vmul.f32 %v645_v42, %v2122_v14 }
  0xf0   : > { %v701_v16 = vstv %s2174_s29  ;;  %s1537_s29 = sld [smem:[#allocation12 + $0x3b]] }
  0xf5   : > { %850 = vrot.lane.b32.xlu0 %v848_v18, %s1855_s25  ;;  %752 = vrot.lane.b32.xlu2 %v750_v19, %s1859_s26  ;;  %v577_v18 = vmul.f32 %v576_v12, %v2024_v51  ;;  %v536_v19 = vstv %s1548_s23  ;;  %s2157_s23 = sld [smem:[#allocation12 + $0x4e]] }
  0xf6   : > { %716 = vrot.lane.b32.xlu1 %v714_v20, %s1857_s5 }
  0xfd   : > { %1082 = vrot.lane.b32.xlu0 %v1080_v24, %s1856_s27  ;;  %841 = vrot.lane.b32.xlu2 %v839_v25, %s1857_s5  ;;  %v537_v24 = vmul.f32 %v536_v19, %v2122_v14 }
  0xfe   : > { %743 = vrot.lane.b32.xlu1 %v741_v26, %s1854_s24  ;;  %v452_v26 = vstv %s2120_s28  ;;  %s2161_s28 = sld [smem:[#allocation12 + $0x31]] }
  0xff   : > { %v453_v34 = vmul.f32 %v452_v26, %v2024_v51 }
 0x105   : > { %1091 = vrot.lane.b32.xlu0 %v1089_v31, %s1857_s5  ;;  %966 = vrot.lane.b32.xlu2 %v964_v32, %s1857_s5  ;;  %v545_v31 = vstv %s1555_s30  ;;  %s2180_s30 = sld [smem:[#allocation12 + $0x3a]] }
 0x106   : > { %832 = vrot.lane.b32.xlu1 %v830_v33, %s1856_s27  ;;  %v563_v33 = vstv %s1569_s9  ;;  %s2184_s9 = sld [smem:[#allocation12 + $0x48]] }
 0x10d   : > { %984 = vrot.lane.b32.xlu0 %v982_v37, %s1858_s7  ;;  %975 = vrot.lane.b32.xlu2 %v973_v38, %s1855_s25  ;;  %v546_v37 = vmul.f32 %v545_v31, %v2122_v14 }
 0x10e   : > { %957 = vrot.lane.b32.xlu1 %v955_v39, %s1856_s27  ;;  %v564_v39 = vmul.f32 %v563_v33, %v2122_v14 }
 0x115   : > { %877 = vrot.lane.b32.xlu0 %v875_v48, %s1859_s26  ;;  %868 = vrot.lane.b32.xlu2 %v866_v49, %s1854_s24 }
 0x116   : > { %859 = vrot.lane.b32.xlu1 %v857_v50, %s1858_s7  ;;  %v654_v50 = vstv %s2139_s10  ;;  %s2207_s10 = sld [smem:[#allocation12 + $0x4f]] }
 0x117   : > { %v655_v57 = vmul.f32 %v654_v50, %v2122_v14  ;;  %v797_v50 = vstv %s2200_s21  ;;  %s2258_s21 = sld [smem:[#allocation12 + $0x42]] }
 0x11d   : > { %1225 = vrot.lane.b32.xlu0 %v1223_v44, %s1855_s25  ;;  %1216 = vrot.lane.b32.xlu2 %v1214_v54, %s1857_s5 }
 0x11e   : > { %1207 = vrot.lane.b32.xlu1 %v1205_v55, %s1856_s27  ;;  %v637_v55 = vmul.f32 %v636_v47, %v2122_v14 }
 0x125   : > { %1234 = vrot.lane.b32.xlu0 %v1232_v59, %s1858_s7  ;;  %1109 = vrot.lane.b32.xlu2 %v1107_v60, %s1858_s7 }
 0x126   : > { %1100 = vrot.lane.b32.xlu1 %v1098_v61, %s1855_s25 }
 0x127   : > { %v2104_v62 = vpop.permute.xlu2 %478 }
 0x128   : > { %v480_v48 = vrot.slane %v2104_v62, 1 }
 0x12a   : > { %v482_v58 = vsel %vm481_vm10, %v2104_v62, %v480_v48  ;;  %v788_v48 = vstv %s2207_s10  ;;  %s2263_s10 = sld [smem:[#allocation12 + $0x33]] }
 0x12d   : > { %1243 = vrot.lane.b32.xlu0 %v1241_v2, %s1854_s24  ;;  %1118 = vrot.lane.b32.xlu2 %v1116_v3, %s1854_s24  ;;  %v672_v2 = vstv %s2154_s18  ;;  %v663_v3 = vstv %s2157_s23  ;;  %s2215_s18 = sld [smem:[#allocation12 + $0x32]] }
 0x12e   : > { %993 = vrot.lane.b32.xlu1 %v991_v4, %s1854_s24  ;;  %s2230_s23 = sld [smem:[#allocation12 + $0x3d]] }
 0x12f   : > { %v2112_v5 = vpop.permute.xlu2 %488 }
 0x130   : > { %v490_v43 = vrot.slane %v2112_v5, 1 }
 0x132   : > { %v492_v61 = vsel %vm491_vm11, %v2112_v5, %v490_v43  ;;  %v515_v5 = vstv %s2161_s28  ;;  %s1538_s28 = sld [smem:[#allocation12 + $0x3c]]  ;;  %v789_v43 = vmul.f32 %v788_v48, %v2122_v14 }
 0x135   : > { %1252 = vrot.lane.b32.xlu0 %v1250_v9, %s1859_s26  ;;  %1127 = vrot.lane.b32.xlu2 %v1125_v10, %s1859_s26  ;;  %v673_v10 = vmul.f32 %v672_v2, %v2122_v14  ;;  %v886_v2 = vstv %s1537_s29  ;;  %s2299_s29 = sld [smem:[#allocation12 + $0x4]] }
 0x136   : > { %1002 = vrot.lane.b32.xlu1 %v1000_v11, %s1859_s26  ;;  %v664_v11 = vmul.f32 %v663_v3, %v2122_v14 }
 0x137   : > { %v583_v13 = vpop.permute.xlu2 %582 }
 0x138   : > { %v584_v15 = vrot.slane %v583_v13, 1 }
 0x13a   : > { %v585_v20 = vsel %vm461_vm8, %v583_v13, %v584_v15  ;;  %v682_v13 = vmul.f32 %v681_v7, %v2122_v14  ;;  %v516_v15 = vmul.f32 %v515_v5, %v2122_v14 }
 0x13b   : > { %v587_v21 = vadd.f32 %v585_v20, %v577_v18  ;;  %v761_v20 = vstv %s2180_s30  ;;  %s2244_s30 = sld [smem:[#allocation12 + $0x5]] }
 0x13c   : > { %v762_v31 = vmul.f32 %v761_v20, %v2122_v14 }
 0x13d   : > { %530 = vrot.lane.b32.xlu0 %v528_v22, %s1857_s5  ;;  %521 = vrot.lane.b32.xlu2 %v519_v23, %s1856_s27  ;;  %v779_v23 = vstv %s2184_s9  ;;  %s2252_s9 = sld [smem:[#allocation12 + $0x44]] }
 0x13e   : > { %539 = vrot.lane.b32.xlu1 %v537_v24, %s1855_s25 }
 0x13f   : > { %v2132_v25 = vpop.permute.xlu2 %609  ;;  %v499_v27 = vpop.permute.xlu0 %498 }
 0x140   : > { %v459_v29 = vpop.permute.xlu1 %458  ;;  %v500_v59 = vrot.slane %v499_v27, 1  ;;  %v611_v24 = vrot.slane %v2132_v25, 1 }
 0x141   : > { %v460_v32 = vrot.slane %v459_v29, 1 }
 0x142   : > { %v502_v4 = vsel %vm501_vm12, %v499_v27, %v500_v59  ;;  %v702_v27 = vmul.f32 %v701_v16, %v2024_v51 }
 0x143   : > { %v462_v35 = vsel %vm461_vm8, %v459_v29, %v460_v32  ;;  %v770_v29 = vstv %s2188_s20  ;;  %s2255_s20 = sld [smem:[#allocation12 + $0x43]]  ;;  %v1145_v16 = vstv %s2252_s9 }
 0x144   : > { %v464_v38 = vadd.f32 %v462_v35, %v453_v34  ;;  %v780_v35 = vmul.f32 %v779_v23, %v2122_v14  ;;  %s2309_s9 = sld [smem:[#allocation12 + $0x57]] }
 0x145   : > { %557 = vrot.lane.b32.xlu0 %v555_v36, %s1854_s24  ;;  %548 = vrot.lane.b32.xlu2 %v546_v37, %s1858_s7  ;;  %v771_v37 = vmul.f32 %v770_v29, %v2122_v14  ;;  %v1146_v29 = vmul.f32 %v1145_v16, %v2122_v14 }
 0x146   : > { %566 = vrot.lane.b32.xlu1 %v564_v39, %s1859_s26 }
 0x147   : > { %v2151_v40 = vpop.permute.xlu2 %725  ;;  %v592_v41 = vpop.permute.xlu0 %591 }
 0x148   : > { %v469_v45 = vpop.permute.xlu1 %468  ;;  %v593_v46 = vrot.slane %v592_v41, 1 }
 0x149   : > { %v470_v49 = vrot.slane %v469_v45, 1 }
 0x14a   : > { %v594_v52 = vsel %vm471_vm9, %v592_v41, %v593_v46 }
 0x14b   : > { %v472_v44 = vsel %vm471_vm9, %v469_v45, %v470_v49  ;;  %v596_v54 = vadd.f32 %v594_v52, %v587_v21  ;;  %v806_v49 = vstv %s2210_s11  ;;  %v633_v52 = vstv %s2215_s18  ;;  %s2272_s11 = sld [smem:[#allocation12 + $0x3]] }
 0x14c   : > { %v474_v56 = vadd.f32 %v472_v44, %v464_v38  ;;  %v612_v38 = vsel %vm491_vm11, %v2132_v25, %v611_v24  ;;  %v807_v44 = vmul.f32 %v806_v49, %v2122_v14  ;;  %s2278_s18 = sld [smem:[#allocation12 + $0x51]] }
 0x14d   : > { %648 = vrot.lane.b32.xlu0 %v646_v53, %s1857_s5  ;;  %639 = vrot.lane.b32.xlu2 %v637_v55, %s1856_s27  ;;  %v798_v55 = vmul.f32 %v797_v50, %v2122_v14 }
 0x14e   : > { %v484_v60 = vadd.f32 %v482_v58, %v474_v56  ;;  %657 = vrot.lane.b32.xlu1 %v655_v57, %s1855_s25  ;;  %v634_v56 = vmul.f32 %v633_v52, %v2122_v14 }
 0x14f   : > { %v2178_v63 = vpop.permute.xlu2 %752  ;;  %v619_v62 = vpop.permute.xlu0 %618 }
 0x150   : > { %v509_v0 = vpop.permute.xlu1 %508  ;;  %v494_v1 = vadd.f32 %v492_v61, %v484_v60  ;;  %v620_v32 = vrot.slane %v619_v62, 1  ;;  %v1136_v61 = vstv %s2230_s23  ;;  %s2281_s23 = sld [smem:[#allocation12 + $0x4a]] }
 0x151   : > { %v510_v6 = vrot.slane %v509_v0, 1 }
 0x152   : > { %v504_v8 = vadd.f32 %v502_v4, %v494_v1  ;;  %v621_v41 = vsel %vm501_vm12, %v619_v62, %v620_v32  ;;  %v1011_v62 = vstv %s1538_s28  ;;  %s2286_s28 = sld [smem:[#allocation12 + $0x49]] }
 0x153   : > { %v512_v9 = vsel %vm511_vm13, %v509_v0, %v510_v6  ;;  %v727_v0 = vrot.slane %v2151_v40, 1  ;;  %v1137_v6 = vmul.f32 %v1136_v61, %v2122_v14  ;;  %v1012_v7 = vmul.f32 %v1011_v62, %v2122_v14 }
 0x154   : > { %v514_v12 = vadd.f32 %v512_v9, %v504_v8  ;;  %v887_v8 = vmul.f32 %v886_v2, %v2122_v14 }
 0x155   : > { %675 = vrot.lane.b32.xlu0 %v673_v10, %s1854_s24  ;;  %666 = vrot.lane.b32.xlu2 %v664_v11, %s1858_s7  ;;  %v728_v9 = vsel %vm481_vm10, %v2151_v40, %v727_v0  ;;  %v1076_v11 = vstv %s2244_s30  ;;  %s2306_s30 = sld [smem:[#allocation12 + $0x5e]] }
 0x156   : > { %684 = vrot.lane.b32.xlu1 %v682_v13, %s1859_s26  ;;  %v2202_v17 = vadd.f32 %v516_v15, %v514_v12  ;;  %v1077_v24 = vmul.f32 %v1076_v11, %v2024_v51  ;;  %v1029_v48 = vstv %s2281_s23  ;;  %s2359_s23 = sld [smem:[#allocation12 + $0x6]] }
 0x157   : > { %v2204_v18 = vpop.permute.xlu2 %841  ;;  %v708_v19 = vpop.permute.xlu0 %707 }
 0x158   : > { %v601_v21 = vpop.permute.xlu1 %600  ;;  %v709_v22 = vrot.slane %v708_v19, 1  ;;  %v904_v52 = vstv %s2286_s28  ;;  %s2365_s28 = sld [smem:[#allocation12 + $0x53]] }
 0x159   : > { %v602_v26 = vrot.slane %v601_v21, 1  ;;  %v905_v62 = vmul.f32 %v904_v52, %v2122_v14 }
 0x15a   : > { %v710_v30 = vsel %vm461_vm8, %v708_v19, %v709_v22  ;;  %v754_v22 = vrot.slane %v2178_v63, 1 }
 0x15b   : > { %v603_v33 = vsel %vm481_vm10, %v601_v21, %v602_v26  ;;  %v712_v34 = vadd.f32 %v710_v30, %v702_v27  ;;  %v1020_v21 = vstv %s2255_s20  ;;  %v895_v26 = vstv %s2258_s21  ;;  %s2315_s20 = sld [smem:[#allocation12 + $0x50]] }
 0x15c   : > { %v605_v36 = vadd.f32 %v603_v33, %v596_v54  ;;  %v1021_v32 = vmul.f32 %v1020_v21, %v2122_v14  ;;  %v758_v33 = vstv %s2263_s10  ;;  %s2336_s21 = sld [smem:[#allocation12 + $0x4c]]  ;;  %v1201_v52 = vstv %s2359_s23  ;;  %s1863_s23 = smov 122  }
 0x15d   : > { %764 = vrot.lane.b32.xlu0 %v762_v31, %s1856_s27  ;;  %782 = vrot.lane.b32.xlu2 %v780_v35, %s1855_s25  ;;  %v896_v35 = vmul.f32 %v895_v26, %v2122_v14  ;;  %s2340_s10 = sld [smem:[#allocation12 + $0x45]] }
 0x15e   : > { %v614_v39 = vadd.f32 %v612_v38, %v605_v36  ;;  %773 = vrot.lane.b32.xlu1 %v771_v37, %s1857_s5  ;;  %v755_v36 = vsel %vm511_vm13, %v2178_v63, %v754_v22  ;;  %v759_v38 = vmul.f32 %v758_v33, %v2122_v14 }
 0x15f   : > { %v2228_v42 = vpop.permute.xlu2 %966  ;;  %v735_v45 = vpop.permute.xlu0 %734 }
 0x160   : > { %v628_v46 = vpop.permute.xlu1 %627  ;;  %v623_v47 = vadd.f32 %v621_v41, %v614_v39  ;;  %v736_v3 = vrot.slane %v735_v45, 1  ;;  %v826_v41 = vstv %s2272_s11  ;;  %s2344_s11 = sld [smem:[#allocation12 + $0x3e]] }
 0x161   : > { %v629_v25 = vrot.slane %v628_v46, 1  ;;  %v913_v11 = vstv %s2315_s20  ;;  %s2394_s20 = sld [smem:[#allocation12 + $0x59]] }
 0x162   : > { %v737_v12 = vsel %vm491_vm11, %v735_v45, %v736_v3 }
 0x163   : > { %v630_v53 = vsel %vm511_vm13, %v628_v46, %v629_v25  ;;  %v1038_v46 = vstv %s2278_s18  ;;  %v843_v25 = vrot.slane %v2204_v18, 1  ;;  %s2356_s18 = sld [smem:[#allocation12 + $0x34]] }
 0x164   : > { %v632_v54 = vadd.f32 %v630_v53, %v623_v47  ;;  %v827_v53 = vmul.f32 %v826_v41, %v2024_v51 }
 0x165   : > { %791 = vrot.lane.b32.xlu0 %v789_v43, %s1858_s7  ;;  %809 = vrot.lane.b32.xlu2 %v807_v44, %s1859_s26  ;;  %v1039_v44 = vmul.f32 %v1038_v46, %v2122_v14  ;;  %v844_v0 = vsel %vm471_vm9, %v2204_v18, %v843_v25  ;;  %v922_v18 = vstv %s2309_s9  ;;  %s2388_s9 = sld [smem:[#allocation12 + $0x61]] }
 0x166   : > { %800 = vrot.lane.b32.xlu1 %v798_v55, %s1854_s24  ;;  %v2246_v57 = vadd.f32 %v634_v56, %v632_v54 }
 0x167   : > { %v2248_v58 = vpop.permute.xlu2 %975  ;;  %v2250_v59 = vpop.permute.xlu0 %850 }
 0x168   : > { %v717_v60 = vpop.permute.xlu1 %716  ;;  %v852_v54 = vrot.slane %v2250_v59, 1 }
 0x169   : > { %v718_v1 = vrot.slane %v717_v60, 1 }
 0x16a   : > { %v853_v2 = vsel %vm481_vm10, %v2250_v59, %v852_v54 }
 0x16b   : > { %v719_v4 = vsel %vm471_vm9, %v717_v60, %v718_v1  ;;  %v1030_v60 = vmul.f32 %v1029_v48, %v2122_v14 }
 0x16c   : > { %v721_v5 = vadd.f32 %v719_v4, %v712_v34  ;;  %v951_v4 = vstv %s2299_s29  ;;  %s2369_s29 = sld [smem:[#allocation12 + $0x52]] }
 0x16d   : > { %1139 = vrot.lane.b32.xlu0 %v1137_v6, %s1856_s27  ;;  %1014 = vrot.lane.b32.xlu2 %v1012_v7, %s1856_s27  ;;  %v952_v59 = vmul.f32 %v951_v4, %v2024_v51 }
 0x16e   : > { %v730_v10 = vadd.f32 %v728_v9, %v721_v5  ;;  %889 = vrot.lane.b32.xlu1 %v887_v8, %s1856_s27  ;;  %v931_v5 = vstv %s2306_s30  ;;  %v968_v9 = vrot.slane %v2228_v42, 1  ;;  %s2374_s30 = sld [smem:[#allocation12 + $0x4b]] }
 0x16f   : > { %v2275_v13 = vpop.permute.xlu2 %868  ;;  %v1083_v15 = vpop.permute.xlu0 %1082  ;;  %v932_v16 = vmul.f32 %v931_v5, %v2122_v14 }
 0x170   : > { %v744_v40 = vpop.permute.xlu1 %743  ;;  %v739_v19 = vadd.f32 %v737_v12, %v730_v10  ;;  %v1084_v20 = vrot.slane %v1083_v15, 1  ;;  %v977_v12 = vrot.slane %v2248_v58, 1  ;;  %v969_v21 = vsel %vm471_vm9, %v2228_v42, %v968_v9 }
 0x171   : > { %v745_v23 = vrot.slane %v744_v40, 1 }
 0x172   : > { %v1085_v27 = vsel %vm461_vm8, %v1083_v15, %v1084_v20  ;;  %v914_v20 = vmul.f32 %v913_v11, %v2122_v14  ;;  %v1163_v54 = vstv %s2369_s29  ;;  %s1865_s29 = smov 123  }
 0x173   : > { %v746_v30 = vsel %vm501_vm12, %v744_v40, %v745_v23  ;;  %v1087_v31 = vadd.f32 %v1085_v27, %v1077_v24  ;;  %v923_v40 = vmul.f32 %v922_v18, %v2122_v14  ;;  %v978_v24 = vsel %vm481_vm10, %v2248_v58, %v977_v12 }
 0x174   : > { %v748_v34 = vadd.f32 %v746_v30, %v739_v19  ;;  %v1279_v30 = vstv %s2336_s21  ;;  %v1172_v12 = vstv %s2394_s20  ;;  %s2420_s21 = sld [smem:[#allocation12 + $0x5a]] }
 0x175   : > { %1148 = vrot.lane.b32.xlu0 %v1146_v29, %s1857_s5  ;;  %1023 = vrot.lane.b32.xlu2 %v1021_v32, %s1857_s5  ;;  %v870_v32 = vrot.slane %v2275_v13, 1 }
 0x176   : > { %v757_v37 = vadd.f32 %v755_v36, %v748_v34  ;;  %898 = vrot.lane.b32.xlu1 %v896_v35, %s1857_s5  ;;  %v1261_v35 = vstv %s2344_s11  ;;  %s1531_s11 = sld [smem:[#allocation12 + $0x35]] }
 0x177   : > { %v2302_v39 = vpop.permute.xlu2 %1216  ;;  %v1092_v45 = vpop.permute.xlu0 %1091  ;;  %v1262_v46 = vmul.f32 %v1261_v35, %v2122_v14 }
 0x178   : > { %v833_v63 = vpop.permute.xlu1 %832  ;;  %v1093_v47 = vrot.slane %v1092_v45, 1  ;;  %v2311_v49 = vadd.f32 %v759_v38, %v757_v37  ;;  %v1280_v38 = vmul.f32 %v1279_v30, %v2122_v14 }
 0x179   : > { %v834_v50 = vrot.slane %v833_v63, 1 }
 0x17a   : > { %v1094_v43 = vsel %vm471_vm9, %v1092_v45, %v1093_v47  ;;  %v883_v47 = vstv %s2356_s18  ;;  %s1862_s18 = smov 125  }
 0x17b   : > { %v835_v55 = vsel %vm461_vm8, %v833_v63, %v834_v50  ;;  %v2322_v56 = vadd.f32 %v1094_v43, %v1087_v31  ;;  %v1270_v31 = vstv %s2340_s10  ;;  %v871_v63 = vsel %vm501_vm12, %v2275_v13, %v870_v32  ;;  %s1533_s10 = sld [smem:[#allocation12 + $0x37]] }
 0x17c   : > { %v837_v61 = vadd.f32 %v835_v55, %v827_v53  ;;  %v1271_v41 = vmul.f32 %v1270_v31, %v2122_v14  ;;  %v884_v55 = vmul.f32 %v883_v47, %v2122_v14 }
 0x17d   : > { %1041 = vrot.lane.b32.xlu0 %v1039_v44, %s1858_s7  ;;  %1032 = vrot.lane.b32.xlu2 %v1030_v60, %s1855_s25  ;;  %v1288_v44 = vstv %s2365_s28  ;;  %v1218_v60 = vrot.slane %v2302_v39, 1  ;;  %s1864_s28 = smov 124  }
 0x17e   : > { %v846_v1 = vadd.f32 %v844_v0, %v837_v61  ;;  %907 = vrot.lane.b32.xlu1 %v905_v62, %s1855_s25  ;;  %v1154_v62 = vstv %s2374_s30  ;;  %v1202_v0 = vmul.f32 %v1201_v52, %v2024_v51  ;;  %s1478_s30 = sshll.u32 %s1978_s4, 1 }
 0x17f   : > { %v2333_v3 = vpop.permute.xlu2 %1109  ;;  %v985_v6 = vpop.permute.xlu0 %984  ;;  %v1155_v18 = vmul.f32 %v1154_v62, %v2122_v14 }
 0x180   : > { %v958_v7 = vpop.permute.xlu1 %957  ;;  %v855_v8 = vadd.f32 %v853_v2, %v846_v1  ;;  %v986_v22 = vrot.slane %v985_v6, 1 }
 0x181   : > { %v959_v10 = vrot.slane %v958_v7, 1 }
 0x182   : > { %v987_v33 = vsel %vm491_vm11, %v985_v6, %v986_v22  ;;  %v1289_v6 = vmul.f32 %v1288_v44, %v2122_v14 }
 0x183   : > { %v960_v15 = vsel %vm461_vm8, %v958_v7, %v959_v10  ;;  %v1164_v7 = vmul.f32 %v1163_v54, %v2122_v14 }
 0x184   : > { %v962_v19 = vadd.f32 %v960_v15, %v952_v59  ;;  %v1306_v59 = vstv %s2388_s9  ;;  %s1578_s9 = sshll.u32 %s1840_s15, 1  ;;  %s1347_s15 = scalar_lea.sflag [#allocation8], %s1978_s4 }
 0x185   : > { %934 = vrot.lane.b32.xlu0 %v932_v16, %s1859_s26  ;;  %925 = vrot.lane.b32.xlu2 %v923_v40, %s1854_s24 }
 0x186   : > { %v971_v23 = vadd.f32 %v969_v21, %v962_v19  ;;  %916 = vrot.lane.b32.xlu1 %v914_v20, %s1858_s7  ;;  %v1111_v19 = vrot.slane %v2333_v3, 1 }
 0x187   : > { %v2363_v26 = vpop.permute.xlu2 %1118  ;;  %v878_v27 = vpop.permute.xlu0 %877 }
 0x188   : > { %v980_v42 = vadd.f32 %v978_v24, %v971_v23  ;;  %v860_v29 = vpop.permute.xlu1 %859  ;;  %v879_v37 = vrot.slane %v878_v27, 1  ;;  %v1307_v24 = vmul.f32 %v1306_v59, %v2122_v14 }
 0x189   : > { %v861_v34 = vrot.slane %v860_v29, 1 }
 0x18a   : > { %v2376_v58 = vadd.f32 %v987_v33, %v980_v42  ;;  %v880_v25 = vsel %vm511_vm13, %v878_v27, %v879_v37  ;;  %v1173_v27 = vmul.f32 %v1172_v12, %v2122_v14  ;;  %v1120_v42 = vrot.slane %v2363_v26, 1 }
 0x18b   : > { %v862_v36 = vsel %vm491_vm11, %v860_v29, %v861_v34  ;;  %v1112_v34 = vsel %vm491_vm11, %v2333_v3, %v1111_v19 }
 0x18c   : > { %v864_v45 = vadd.f32 %v862_v36, %v855_v8  ;;  %v1219_v8 = vsel %vm471_vm9, %v2302_v39, %v1218_v60 }
 0x18d   : > { %1282 = vrot.lane.b32.xlu0 %v1280_v38, %s1855_s25  ;;  %1273 = vrot.lane.b32.xlu2 %v1271_v41, %s1857_s5  ;;  %s2418_s5 = sld [smem:[#allocation12 + $0x36]] }
 0x18e   : > { %v873_v48 = vadd.f32 %v871_v63, %v864_v45  ;;  %1264 = vrot.lane.b32.xlu1 %v1262_v46, %s1856_s27  ;;  %s2401_s27 = sld [smem:[#allocation12 + $0x58]]  ;;  %v1297_v46 = vstv %s2420_s21  ;;  %s233_s21 = scalar_lea.vmem [#allocation13], %s1478_s30 }
 0x18f   : > { %v2391_v50 = vpop.permute.xlu2 %1127  ;;  %v1226_v53 = vpop.permute.xlu0 %1225 }
 0x190   : > { %v882_v13 = vadd.f32 %v880_v25, %v873_v48  ;;  %v1208_v43 = vpop.permute.xlu1 %1207  ;;  %v1227_v4 = vrot.slane %v1226_v53, 1  ;;  %v1129_v35 = vrot.slane %v2391_v50, 1 }
 0x191   : > { %v1209_v61 = vrot.slane %v1208_v43, 1 }
 0x192   : > { %v2404_v1 = vadd.f32 %v884_v55, %v882_v13  ;;  %v1228_v9 = vsel %vm481_vm10, %v1226_v53, %v1227_v4  ;;  %v1130_v63 = vsel %vm511_vm13, %v2391_v50, %v1129_v35 }
 0x193   : > { %v1210_v2 = vsel %vm461_vm8, %v1208_v43, %v1209_v61  ;;  %v1133_v38 = vstv %s2418_s5  ;;  %v1298_v43 = vmul.f32 %v1297_v46, %v2122_v14  ;;  %s1357_s5 = scalar_lea.hbm %s2597_s3, %s1578_s9 }
 0x194   : > { %v1212_v5 = vadd.f32 %v1210_v2, %v1202_v0  ;;  %v1047_v21 = vstv %s2401_s27  ;;  %v1258_v0 = vstv %s1533_s10 }
 0x195   : > { %1291 = vrot.lane.b32.xlu0 %v1289_v6, %s1858_s7  ;;  %1166 = vrot.lane.b32.xlu2 %v1164_v7, %s1858_s7  ;;  %s2424_s7 = sld [smem:[#allocation12 + $0x5f]]  ;;  %v1048_v33 = vmul.f32 %v1047_v21, %v2122_v14  ;;  %v1008_v6 = vstv %s1531_s11 }
 0x196   : > { %v1221_v51 = vadd.f32 %v1219_v8, %v1212_v5  ;;  %1157 = vrot.lane.b32.xlu1 %v1155_v18, %s1855_s25  ;;  %s2443_s25 = sld [smem:[#allocation12 + $0x60]]  ;;  %v1259_v18 = vmul.f32 %v1258_v0, %v2122_v14 }
 0x197   : > { %v522_v10 = vpop.permute.xlu2 %521  ;;  %v1235_v11 = vpop.permute.xlu0 %1234 }
 0x198   : > { %v1230_v15 = vadd.f32 %v1228_v9, %v1221_v51  ;;  %v1101_v16 = vpop.permute.xlu1 %1100  ;;  %v523_v40 = vrot.slane %v522_v10, 1  ;;  %v1236_v39 = vrot.slane %v1235_v11, 1  ;;  %v1009_v9 = vmul.f32 %v1008_v6, %v2122_v14 }
 0x199   : > { %v1102_v20 = vrot.slane %v1101_v16, 1 }
 0x19a   : > { %v524_v22 = vsel %vm461_vm8, %v522_v10, %v523_v40  ;;  %v1237_v23 = vsel %vm491_vm11, %v1235_v11, %v1236_v39 }
 0x19b   : > { %v1103_v29 = vsel %vm481_vm10, %v1101_v16, %v1102_v20  ;;  %v526_v30 = vadd.f32 %v524_v22, %v2202_v17  ;;  %v1239_v31 = vadd.f32 %v1237_v23, %v1230_v15  ;;  %v1121_v17 = vsel %vm501_vm12, %v2363_v26, %v1120_v42 }
 0x19c   : > { %v1105_v32 = vadd.f32 %v1103_v29, %v2322_v56  ;;  %v1056_v48 = vstv %s2424_s7  ;;  %v1134_v26 = vmul.f32 %v1133_v38, %v2122_v14  ;;  %v1181_v4 = vstv %s2443_s25  ;;  %s1359_s7 = sshll.u32 %s233_s21, 4  ;;  %s1361_s25 = sshll.u32 %s1357_s5, 4  ;;  %s1360_s7 = int_to_ptr.vmem [resolvable:$true] %s1359_s7  ;;  %s1362_s25 = int_to_ptr.hbm [resolvable:$true] %s1361_s25 }
 0x19d   : > { %1309 = vrot.lane.b32.xlu0 %v1307_v24, %s1859_s26  ;;  %1175 = vrot.lane.b32.xlu2 %v1173_v27, %s1854_s24  ;;  %v1057_v54 = vmul.f32 %v1056_v48, %v2122_v14  ;;  %v1182_v51 = vmul.f32 %v1181_v4, %v2122_v14  ;;  %s1772_s10 = sshra.s32 %s1362_s25, 4  ;;  %s1773_s10 = int_to_ptr.hbm [resolvable:$true] %s1772_s10 }
 0x19e   : > { %v1114_v36 = vadd.f32 %v1112_v34, %v1105_v32  ;;  %1050 = vrot.lane.b32.xlu1 %v1048_v33, %s1854_s24  ;;  %s1774_s11 = scalar_lea.hbm %s1773_s10, 2  ;;  %p1779_p11 = scmp.lt.s32.totalorder %s1773_s10, %s2597_s3 }
 0x19f   : > { %v549_v56 = vpop.permute.xlu2 %548  ;;  %v1244_v37 = vpop.permute.xlu0 %1243  ;;  %p1775_p1 = scmp.ne.s32.totalorder %s1773_s10, %s1774_s11 }
 0x1a0   : > { %v1123_v41 = vadd.f32 %v1121_v17, %v1114_v36  ;;  %v994_v3 = vpop.permute.xlu1 %993  ;;  %v1245_v45 = vrot.slane %v1244_v37, 1  ;;  %v550_v39 = vrot.slane %v549_v56, 1 }
 0x1a1   : > { %v995_v47 = vrot.slane %v994_v3, 1  ;;  %p1776_p3 = pnand %p1775_p1, %p1958_p2 }
 0x1a2   : > { %v1246_v25 = vsel %vm501_vm12, %v1244_v37, %v1245_v45  ;;  %v1132_v52 = vadd.f32 %v1130_v63, %v1123_v41  ;;  %v551_v14 = vsel %vm491_vm11, %v549_v56, %v550_v39 }
 0x1a3   : > { %v996_v53 = vsel %vm501_vm12, %v994_v3, %v995_v47  ;;  %v1248_v13 = vadd.f32 %v1246_v25, %v1239_v31  ;;  %p1777_p7 = pneg %p1776_p3 }
 0x1a4   : > { %v998_v44 = vadd.f32 %v996_v53, %v2376_v58  ;;  %v2456_v55 = vadd.f32 %v1134_v26, %v1132_v52 }
 0x1a5   : > { %1300 = vrot.lane.b32.xlu2 %v1298_v43, %s1854_s24  ;;  %s1860_s24 = smov 127  }
 0x1a6   : > { %1059 = vrot.lane.b32.xlu1 %v1057_v54, %s1859_s26 }
 0x1a7   : > { %v640_v50 = vpop.permute.xlu2 %639  ;;  %v1253_v60 = vpop.permute.xlu0 %1252 }
 0x1a8   : > { %v1003_v61 = vpop.permute.xlu1 %1002  ;;  %v1254_v62 = vrot.slane %v1253_v60, 1  ;;  %v641_v32 = vrot.slane %v640_v50, 1 }
 0x1a9   : > { %v1004_v2 = vrot.slane %v1003_v61, 1 }
 0x1aa   : > { %v1255_v7 = vsel %vm511_vm13, %v1253_v60, %v1254_v62 }
 0x1ab   : > { %v1005_v58 = vsel %vm511_vm13, %v1003_v61, %v1004_v2  ;;  %v1257_v5 = vadd.f32 %v1255_v7, %v1248_v13 }
 0x1ac   : > { %v1007_v8 = vadd.f32 %v1005_v58, %v998_v44 }
 0x1ad   : > { %v2466_v10 = vadd.f32 %v1259_v18, %v1257_v5 }
 0x1ae   : > { %1184 = vrot.lane.b32.xlu1 %v1182_v51, %s1859_s26  ;;  %v2469_v11 = vadd.f32 %v1009_v9, %v1007_v8  ;;  %s1861_s26 = smov 126  }
 0x1af   : > { %v667_v59 = vpop.permute.xlu2 %666  ;;  %v531_v12 = vpop.permute.xlu0 %530 }
 0x1b0   : > { %v540_v15 = vpop.permute.xlu1 %539  ;;  %v532_v16 = vrot.slane %v531_v12, 1  ;;  %v668_v63 = vrot.slane %v667_v59, 1 }
 0x1b1   : > { %v541_v40 = vrot.slane %v540_v15, 1 }
 0x1b2   : > { %v533_v19 = vsel %vm471_vm9, %v531_v12, %v532_v16  ;;  %v669_v26 = vsel %vm491_vm11, %v667_v59, %v668_v63 }
 0x1b3   : > { %v535_v20 = vadd.f32 %v533_v19, %v526_v30  ;;  %v542_v21 = vsel %vm481_vm10, %v540_v15, %v541_v40  ;;  %v642_v30 = vsel %vm461_vm8, %v640_v50, %v641_v32 }
 0x1b4   : > { %v644_v41 = vadd.f32 %v642_v30, %v2246_v57 }
 0x1b5   : > { %v544_v22 = vadd.f32 %v542_v21, %v535_v20 }
 0x1b7   : > { %v783_v23 = vpop.permute.xlu2 %782  ;;  %v553_v24 = vadd.f32 %v551_v14, %v544_v22  ;;  %v558_v27 = vpop.permute.xlu0 %557 }
 0x1b8   : > { %v567_v42 = vpop.permute.xlu1 %566  ;;  %v559_v29 = vrot.slane %v558_v27, 1  ;;  %v784_v58 = vrot.slane %v783_v23, 1 }
 0x1b9   : > { %v568_v31 = vrot.slane %v567_v42, 1 }
 0x1ba   : > { %v560_v33 = vsel %vm501_vm12, %v558_v27, %v559_v29  ;;  %v785_v9 = vsel %vm481_vm10, %v783_v23, %v784_v58 }
 0x1bb   : > { %v562_v34 = vadd.f32 %v560_v33, %v553_v24  ;;  %v569_v35 = vsel %vm511_vm13, %v567_v42, %v568_v31 }
 0x1bd   : > { %v2476_v36 = vadd.f32 %v569_v35, %v562_v34 }
 0x1bf   : > { %v810_v17 = vpop.permute.xlu2 %809  ;;  %v649_v37 = vpop.permute.xlu0 %648 }
 0x1c0   : > { %v658_v38 = vpop.permute.xlu1 %657  ;;  %v650_v56 = vrot.slane %v649_v37, 1  ;;  %v811_v40 = vrot.slane %v810_v17, 1 }
 0x1c1   : > { %v659_v3 = vrot.slane %v658_v38, 1 }
 0x1c2   : > { %v651_v45 = vsel %vm471_vm9, %v649_v37, %v650_v56  ;;  %v812_v21 = vsel %vm511_vm13, %v810_v17, %v811_v40 }
 0x1c3   : > { %v653_v46 = vadd.f32 %v651_v45, %v644_v41  ;;  %v660_v47 = vsel %vm481_vm10, %v658_v38, %v659_v3 }
 0x1c5   : > { %v662_v48 = vadd.f32 %v660_v47, %v653_v46 }
 0x1c7   : > { %v2482_v25 = vpop.permute.xlu2 %1014  ;;  %v676_v52 = vpop.permute.xlu0 %675  ;;  %v671_v44 = vadd.f32 %v669_v26, %v662_v48 }
 0x1c8   : > { %v685_v53 = vpop.permute.xlu1 %684  ;;  %v677_v13 = vrot.slane %v676_v52, 1 }
 0x1c9   : > { %v686_v43 = vrot.slane %v685_v53, 1 }
 0x1ca   : > { %v678_v54 = vsel %vm501_vm12, %v676_v52, %v677_v13 }
 0x1cb   : > { %v680_v57 = vadd.f32 %v678_v54, %v671_v44  ;;  %v687_v50 = vsel %vm511_vm13, %v685_v53, %v686_v43 }
 0x1cd   : > { %v689_v60 = vadd.f32 %v687_v50, %v680_v57 }
 0x1cf   : > { %v2487_v61 = vpop.permute.xlu2 %1023  ;;  %691 = vrot.lane.b32.xlu2 %v689_v60, %s1860_s24  ;;  %v765_v62 = vpop.permute.xlu0 %764 }
 0x1d0   : > { %v774_v0 = vpop.permute.xlu1 %773  ;;  %v766_v2 = vrot.slane %v765_v62, 1 }
 0x1d1   : > { %v775_v4 = vrot.slane %v774_v0, 1 }
 0x1d2   : > { %v767_v6 = vsel %vm461_vm8, %v765_v62, %v766_v2 }
 0x1d3   : > { %v769_v7 = vadd.f32 %v767_v6, %v2311_v49  ;;  %v776_v5 = vsel %vm471_vm9, %v774_v0, %v775_v4 }
 0x1d5   : > { %v778_v18 = vadd.f32 %v776_v5, %v769_v7 }
 0x1d7   : > { %v2492_v8 = vpop.permute.xlu2 %1032  ;;  %v792_v51 = vpop.permute.xlu0 %791  ;;  %v787_v16 = vadd.f32 %v785_v9, %v778_v18 }
 0x1d8   : > { %v801_v59 = vpop.permute.xlu1 %800  ;;  %v793_v12 = vrot.slane %v792_v51, 1 }
 0x1d9   : > { %v802_v15 = vrot.slane %v801_v59, 1 }
 0x1da   : > { %v794_v39 = vsel %vm491_vm11, %v792_v51, %v793_v12 }
 0x1db   : > { %v796_v19 = vadd.f32 %v794_v39, %v787_v16  ;;  %v803_v20 = vsel %vm501_vm12, %v801_v59, %v802_v15  ;;  %v1016_v59 = vrot.slane %v2482_v25, 1  ;;  %v1025_v16 = vrot.slane %v2487_v61, 1 }
 0x1dd   : > { %v805_v49 = vadd.f32 %v803_v20, %v796_v19  ;;  %v1017_v39 = vsel %vm461_vm8, %v2482_v25, %v1016_v59  ;;  %v825_v59 = vld [vmem:[#allocation10 + $0x3] ss:$8 sm:$0x3] }
 0x1df   : > { %v2498_v22 = vpop.permute.xlu0 %1139  ;;  %v814_v14 = vadd.f32 %v812_v21, %v805_v49  ;;  %v926_v27 = vpop.permute.xlu2 %925 }
 0x1e0   : > { %v890_v24 = vpop.permute.xlu1 %889  ;;  %v927_v46 = vrot.slane %v926_v27, 1  ;;  %v1141_v19 = vrot.slane %v2498_v22, 1 }
 0x1e1   : > { %816 = vrot.lane.b32.xlu0 %v814_v14, %s1861_s26  ;;  %v891_v31 = vrot.slane %v890_v24, 1 }
 0x1e2   : > { %v928_v53 = vsel %vm501_vm12, %v926_v27, %v927_v46 }
 0x1e3   : > { %v892_v35 = vsel %vm461_vm8, %v890_v24, %v891_v31  ;;  %v1026_v24 = vsel %vm471_vm9, %v2487_v61, %v1025_v16  ;;  %v1019_v31 = vadd.f32 %v1017_v39, %v2469_v11 }
 0x1e4   : > { %v894_v38 = vadd.f32 %v892_v35, %v2404_v1 }
 0x1e7   : > { %v2500_v23 = vpop.permute.xlu0 %1148  ;;  %v1274_v29 = vpop.permute.xlu2 %1273 }
 0x1e8   : > { %v899_v42 = vpop.permute.xlu1 %898  ;;  %v1275_v60 = vrot.slane %v1274_v29, 1  ;;  %v1150_v27 = vrot.slane %v2500_v23, 1 }
 0x1e9   : > { %v900_v34 = vrot.slane %v899_v42, 1 }
 0x1ea   : > { %v1276_v2 = vsel %vm471_vm9, %v1274_v29, %v1275_v60  ;;  %v1151_v61 = vsel %vm471_vm9, %v2500_v23, %v1150_v27  ;;  %v1075_v27 = vld [vmem:[#allocation10 + $0x5] ss:$8 sm:$0x3] }
 0x1eb   : > { %v901_v17 = vsel %vm471_vm9, %v899_v42, %v900_v34  ;;  %v1142_v34 = vsel %vm461_vm8, %v2498_v22, %v1141_v19 }
 0x1ec   : > { %v903_v3 = vadd.f32 %v901_v17, %v894_v38  ;;  %v1028_v38 = vadd.f32 %v1026_v24, %v1019_v31  ;;  %v1200_v31 = vld [vmem:[#allocation10 + $0x6] ss:$8 sm:$0x3] }
 0x1ef   : > { %v2502_v32 = vpop.permute.xlu0 %1041  ;;  %v2506_v37 = vpop.permute.xlu2 %1166 }
 0x1f0   : > { %v908_v33 = vpop.permute.xlu1 %907  ;;  %v1043_v42 = vrot.slane %v2502_v32, 1 }
 0x1f1   : > { %v909_v30 = vrot.slane %v908_v33, 1 }
 0x1f3   : > { %v910_v56 = vsel %vm481_vm10, %v908_v33, %v909_v30 }
 0x1f4   : > { %v912_v47 = vadd.f32 %v910_v56, %v903_v3  ;;  %v1044_v56 = vsel %vm491_vm11, %v2502_v32, %v1043_v42 }
 0x1f7   : > { %v935_v41 = vpop.permute.xlu0 %934  ;;  %v2512_v43 = vpop.permute.xlu2 %1175 }
 0x1f8   : > { %v917_v45 = vpop.permute.xlu1 %916  ;;  %v936_v52 = vrot.slane %v935_v41, 1 }
 0x1f9   : > { %v918_v63 = vrot.slane %v917_v45, 1 }
 0x1fa   : > { %v937_v44 = vsel %vm511_vm13, %v935_v41, %v936_v52 }
 0x1fb   : > { %v919_v48 = vsel %vm491_vm11, %v917_v45, %v918_v63  ;;  %v1168_v63 = vrot.slane %v2506_v37, 1 }
 0x1fc   : > { %v921_v26 = vadd.f32 %v919_v48, %v912_v47 }
 0x1fe   : > { %v930_v13 = vadd.f32 %v928_v53, %v921_v26  ;;  %v1169_v26 = vsel %vm491_vm11, %v2506_v37, %v1168_v63 }
 0x1ff   : > { %v1283_v1 = vpop.permute.xlu0 %1282  ;;  %v1301_v18 = vpop.permute.xlu2 %1300 }
 0x200   : > { %v939_v54 = vadd.f32 %v937_v44, %v930_v13  ;;  %v1265_v57 = vpop.permute.xlu1 %1264  ;;  %v1284_v4 = vrot.slane %v1283_v1, 1  ;;  %v1302_v15 = vrot.slane %v1301_v18, 1 }
 0x201   : > { %v1266_v50 = vrot.slane %v1265_v57, 1 }
 0x202   : > { %941 = vrot.lane.b32.xlu1 %v939_v54, %s1862_s18  ;;  %v1285_v51 = vsel %vm481_vm10, %v1283_v1, %v1284_v4  ;;  %v1303_v49 = vsel %vm501_vm12, %v1301_v18, %v1302_v15  ;;  %s1778_s18 = scalar_lea.hbm %s2597_s3, 4 }
 0x203   : > { %v1267_v62 = vsel %vm461_vm8, %v1265_v57, %v1266_v50  ;;  %p1780_p12 = scmp.lt.s32.totalorder %s1778_s18, %s1774_s11 }
 0x204   : > { %v1269_v0 = vadd.f32 %v1267_v62, %v2466_v10  ;;  %v1034_v10 = vrot.slane %v2492_v8, 1 }
 0x205   : > { %p1781_p13 = por %p1780_p12, %p1779_p11 }
 0x206   : > { %v1278_v6 = vadd.f32 %v1276_v2, %v1269_v0  ;;  %v1035_v25 = vsel %vm481_vm10, %v2492_v8, %v1034_v10  ;;  %v1144_v8 = vadd.f32 %v1142_v34, %v2456_v55  ;;  %v1177_v55 = vrot.slane %v2512_v43, 1  ;;  %v950_v10 = vld [vmem:[#allocation10 + $0x4] ss:$8 sm:$0x3] }
 0x207   : > { %v1292_v7 = vpop.permute.xlu0 %1291  ;;  %v1037_v11 = vadd.f32 %v1035_v25, %v1028_v38  ;;  %p1782_p0 = pnand %p1781_p13, %p1777_p7 }
 0x208   : > { %v1158_v58 = vpop.permute.xlu1 %1157  ;;  %v1293_v5 = vrot.slane %v1292_v7, 1  ;;  %v1287_v12 = vadd.f32 %v1285_v51, %v1278_v6  ;;  %v1153_v22 = vadd.f32 %v1151_v61, %v1144_v8  ;;  %v1178_v44 = vsel %vm501_vm12, %v2512_v43, %v1177_v55  ;;  %v575_v6 = vld [vmem:[#allocation10 + $0x1] ss:$8 sm:$0x3] }
 0x209   : > { %v1159_v35 = vrot.slane %v1158_v58, 1  ;;  %v1046_v45 = vadd.f32 %v1044_v56, %v1037_v11  ;;  %v700_v43 = vld [vmem:[#allocation10 + $0x2] ss:$8 sm:$0x3] }
 0x20a   : > { %v1294_v9 = vsel %vm491_vm11, %v1292_v7, %v1293_v5  ;;  %v451_v5 = vld [vmem:[#allocation10] ss:$8 sm:$0x3] }
 0x20b   : > { %v1296_v40 = vadd.f32 %v1294_v9, %v1287_v12  ;;  %v1160_v41 = vsel %vm481_vm10, %v1158_v58, %v1159_v35  ;;  %v572_v15 = vmul.f32 %v2476_v36, %v451_v5 }
 0x20c   : > { %v1162_v48 = vadd.f32 %v1160_v41, %v1153_v22 }
 0x20d   : > { %v1305_v29 = vadd.f32 %v1303_v49, %v1296_v40 }
 0x20e   : > { %v1171_v53 = vadd.f32 %v1169_v26, %v1162_v48 }
 0x20f   : > { %v1310_v20 = vpop.permute.xlu0 %1309 }
 0x210   : > { %v1051_v21 = vpop.permute.xlu1 %1050  ;;  %v1311_v14 = vrot.slane %v1310_v20, 1  ;;  %v1180_v54 = vadd.f32 %v1178_v44, %v1171_v53 }
 0x211   : > { %v1052_v30 = vrot.slane %v1051_v21, 1 }
 0x212   : > { %v1312_v33 = vsel %vm511_vm13, %v1310_v20, %v1311_v14 }
 0x213   : > { %v1314_v17 = vadd.f32 %v1312_v33, %v1305_v29  ;;  %v1053_v3 = vsel %vm501_vm12, %v1051_v21, %v1052_v30 }
 0x214   : > { %v1055_v23 = vadd.f32 %v1053_v3, %v1046_v45 }
 0x215   : > { %1316 = vrot.lane.b32.xlu1 %v1314_v17, %s1863_s23 }
 0x218   : > { %v1060_v46 = vpop.permute.xlu1 %1059 }
 0x219   : > { %v1061_v47 = vrot.slane %v1060_v46, 1 }
 0x21b   : > { %v1062_v52 = vsel %vm511_vm13, %v1060_v46, %v1061_v47 }
 0x21c   : > { %v1064_v32 = vadd.f32 %v1062_v52, %v1055_v23 }
 0x21e   : > { %1066 = vrot.lane.b32.xlu2 %v1064_v32, %s1864_s28 }
 0x220   : > { %v1185_v13 = vpop.permute.xlu1 %1184 }
 0x221   : > { %v1186_v1 = vrot.slane %v1185_v13, 1 }
 0x223   : > { %v1187_v57 = vsel %vm511_vm13, %v1185_v13, %v1186_v1 }
 0x224   : > { %v1189_v50 = vadd.f32 %v1187_v57, %v1180_v54 }
 0x226   : > { %1191 = vrot.lane.b32.xlu0 %v1189_v50, %s1865_s29 }
 0x229   : > { %v692_v60 = vpop.permute.xlu2 %691 }
 0x22a   : > { %v693_v0 = vrot.slane %v692_v60, 1 }
 0x22c   : > { %v695_v7 = vsel %vm694_vm14, %v692_v60, %v693_v0 }
 0x22d   : > { %v697_v9 = vmul.f32 %v695_v7, %v575_v6 }
 0x22f   : > { %v698_v19 = vadd.f32 %v697_v9, %v572_v15 }
 0x253   : > { %v817_v62 = vpop.permute.xlu0 %816 }
 0x254   : > { %v818_v2 = vrot.slane %v817_v62, 1 }
 0x256   : > { %v820_v18 = vsel %vm819_vm15, %v817_v62, %v818_v2 }
 0x257   : > { %v822_v16 = vmul.f32 %v820_v18, %v700_v43 }
 0x259   : > { %v823_v21 = vadd.f32 %v822_v16, %v698_v19 }
 0x274   : > { %v942_v37 = vpop.permute.xlu1 %941 }
 0x275   : > { %v943_v58 = vrot.slane %v942_v37, 1 }
 0x277   : > { %v945_v12 = vsel %vm944_vm0, %v942_v37, %v943_v58 }
 0x278   : > { %v1067_v4 = vpop.permute.xlu2 %1066  ;;  %v947_v20 = vmul.f32 %v945_v12, %v825_v59 }
 0x279   : > { %v1068_v51 = vrot.slane %v1067_v4, 1 }
 0x27a   : > { %v948_v29 = vadd.f32 %v947_v20, %v823_v21 }
 0x27b   : > { %v1070_v39 = vsel %vm1069_vm1, %v1067_v4, %v1068_v51 }
 0x27c   : > { %v1072_v14 = vmul.f32 %v1070_v39, %v950_v10 }
 0x27e   : > { %v1073_v33 = vadd.f32 %v1072_v14, %v948_v29 }
 0x287   : > { %v1317_v40 = vpop.permute.xlu1 %1316 }
 0x288   : > { %v1318_v49 = vrot.slane %v1317_v40, 1 }
 0x28a   : > { %v1320_v25 = vsel %vm1319_vm2, %v1317_v40, %v1318_v49 }
 0x28b   : > { %v1322_v35 = vmul.f32 %v1320_v25, %v1200_v31 }
 0x298   : > { %v1192_v24 = vpop.permute.xlu0 %1191 }
 0x299   : > { %v1193_v42 = vrot.slane %v1192_v24, 1 }
 0x29b   : > { %v1195_v36 = vsel %vm1194_vm4, %v1192_v24, %v1193_v42 }
 0x29c   : > { %v1197_v34 = vmul.f32 %v1195_v36, %v1075_v27 }
 0x29e   : > { %v1198_v30 = vadd.f32 %v1197_v34, %v1073_v33 }
 0x2a0   : > { %v1323_v17 = vadd.f32 %v1322_v35, %v1198_v30 }
 0x2a2   : > { %v1576_v38 = vmul.f32 -1.442695, %v1323_v17 }
 0x2a4   : > { %1679 = vpow2.f32 %v1576_v38 }
 0x2aa   : > { %v1680_v61 = vpop.eup %1679 }
 0x2ab   : > { %v1327_v56 = vadd.f32 1.0, %v1680_v61 }
 0x2ad   : > { %1681 = vrcp.f32 %v1327_v56  ;;  %v1339_v3 = vand.u32 2147483648, %v1327_v56  ;;  %v1337_v45 = vand.u32 2147483647, %v1327_v56  ;;  %vm1333_vm6 = vweird.f32 %v1327_v56 }
 0x2af   : > { %v1340_v63 = vor.u32 1.1754944e-38, %v1339_v3  ;;  %vm1338_vm8 = vcmp.eq.f32.partialorder %v1337_v45, 8.507059e+37 }
 0x2b3   : > { %v1682_v11 = vpop.eup %1681 }
 0x2b4   : > { %v1329_v8 = vmul.f32 %v1682_v11, %v1327_v56  ;;  %vm1334_vm5 = vweird.f32 %v1682_v11 }
 0x2b5   : > { %vm1335_vm7 = vmor %vm1333_vm6, %vm1334_vm5 }
 0x2b6   : > { %v1330_v41 = vsub.f32 1.0, %v1329_v8 }
 0x2b8   : > { %v1331_v22 = vmul.f32 %v1682_v11, %v1330_v41 }
 0x2ba   : > { %v1332_v46 = vadd.f32 %v1682_v11, %v1331_v22 }
 0x2bc   : > { %v1336_v47 = vsel %vm1335_vm7, %v1682_v11, %v1332_v46 }
 0x2bd   : > { %v1341_v48 = vsel %vm1338_vm8, %v1340_v63, %v1336_v47 }
 0x2be   : > { %1345 = vst.msk [vmem:[%s233_s21] sm:$0x3] %vm1998_vm3, %v1341_v48 }
 0x2bf   : > { %1785 = shalt.err (!%p1782_p0)
}
 0x2c0   : > { %1592 = dma.vmem_to_hbm [thread:$0]  (%p1958_p2), %s1360_s7, 32, %s1362_s25, %s1347_s15  }
 0x2c1 PF: > { %s1373_s4 = sand.u32 1, %s1828_s12   ;;  %p1606_p4 = pnand %p1470_p8, %p1931_p5 }
 0x2c2   : > { %s1374_s29 = scalar_lea.sflag [#allocation8], %s1373_s4 }
 0x2c3   : > { %p1607_p6 = pneg %p1606_p4 }
 0x2c5   : > { %1823 = dma.done.wait (%p1607_p6), %s1374_s29, 32  }
 0x2c6   : > { %1825 = vsyncadd (%p1607_p6), %s1374_s29, 4294967264  ;;  %s21_s17 = sadd.s32 1, %s1848_s17   ;;  %s2609_s12 = smov %s1832_s13 }
 0x2c7   : > { %p18_p9 = scmp.ge.s32.totalorder %s21_s17, 4   ;;  %s2610_s13 = smov %s1836_s14 }
 0x2c8   : > { %s2611_s14 = smov %s1968_s19  ;;  %s2612_s15 = smov %s1844_s16 }
 0x2c9   : > { %s2613_s16 = smov %s2615_s6  ;;  %20 = sbr.rel (!%p18_p9) target bundleno = 8 (0x8), region = 104 }
 0x2ce   :  { %1380 = vsyncpa [#allocation7], 1 }
 0x2cf   :  { %1382 = vsyncpa [#allocation7 + $0x1], 1 }
 0x2d0   :  { %1383 = vsyncpa [#allocation11], 1 }
 0x2d1   :  { %1384 = vsyncpa [#allocation8], 1 }
 0x2d2   :  { %1386 = vsyncpa [#allocation8 + $0x1], 1 }
 0x2d3   :  { %1387 = vsyncpa [#allocation9], 1 }
 0x2d4   :  { %1389 = vsyncpa [#allocation9 + $0x1], 1 }

</bundles_post_ra>
